<compile_context>
chip_gen: v5e
topology: v5e:2x2
jax: 0.10.0
libtpu: 0.0.40
codegen_flags: <defaults>
</compile_context>

<pallas_src>
import jax
import jax.numpy as jnp
from jax import lax
from jax.experimental import pallas as pl
from jax.experimental.pallas import tpu as pltpu


def adown_kernel(xb_ref, xt_ref, xbo_ref, w_ref, b_ref, out_ref):
    # xb_ref : (1, 2*TH, Wo, 2*C1) body input rows [2*t*TH, 2*(t+1)*TH)
    #                              lanes = [even input cols | odd input cols]
    # xt_ref : (1, 1,    Wo, 2*C1) halo row 2*t*TH - 1   (clamped; pad if t==0)
    # xbo_ref: (1, 1,    Wo, 2*C1) halo row 2*(t+1)*TH   (clamped; pad if last)
    # w_ref  : (10*C1h, C2) bf16 packed weights (BN scale folded in)
    # b_ref  : (1, C2)      f32 folded BN bias
    # out_ref: (1, TH, Wo, C2) NHWC output tile
    _, TH2, Wo, C1x2 = xb_ref.shape
    TH = TH2 // 2
    C1 = C1x2 // 2
    C1h = C1 // 2
    C2 = out_ref.shape[-1]
    f32 = jnp.float32
    NEG = jnp.finfo(f32).min        # "-inf" pad for the max-pool branch

    t = pl.program_id(1)
    is_first = t == 0
    is_last = t == pl.num_programs(1) - 1

    # ---- assemble the (2*TH + 2)-row input slab and split row phases -------
    body = xb_ref[0].astype(f32)                       # (2TH, Wo, 2C1)
    top = xt_ref[0].astype(f32)                        # (1,   Wo, 2C1)
    bot = xbo_ref[0].astype(f32)                       # (1,   Wo, 2C1)
    xt = jnp.concatenate([top, body, bot], axis=0)     # (2TH+2, Wo, 2C1)
    xr = xt.reshape(TH + 1, 2, Wo, 2 * C1)             # free leading-dim split
    xi_e = xr[:, 0]   # input rows 2tTH-1 + {0,2,...,2TH}   (TH+1, Wo, 2C1)
    xi_o = xr[:, 1]   # input rows 2tTH-1 + {1,3,...,2TH+1} (TH+1, Wo, 2C1)

    # ---- 2x2/s1 avg pool in the column-deinterleaved layout (f32) ----------
    def pool_pair(a, b):
        # a = input row r, b = input row r+1 (both (rows, Wo, 2C1))
        ae, ao = a[..., :C1], a[..., C1:]
        be, bo = b[..., :C1], b[..., C1:]
        ce = 0.25 * ((ae + ao) + (be + bo))                                # pooled even cols
        co = 0.25 * ((ao[:, :Wo - 1] + ae[:, 1:]) +
                     (bo[:, :Wo - 1] + be[:, 1:]))                         # pooled odd cols
        return ce, co                                  # (rows, Wo, C1), (rows, Wo-1, C1)

    # pooled rows at even local index 0,2,...,2TH   (TH+1 rows, may be pad rows)
    eE, oE = pool_pair(xi_e, xi_o)
    # pooled rows at odd local index 1,3,...,2TH-1  (TH rows, never pad rows)
    eO, oO = pool_pair(xi_o[0:TH], xi_e[1:TH + 1])

    # per-channel pad value: 0 for the conv half, -inf-like for the max half
    cid = lax.broadcasted_iota(jnp.int32, (1, 1, C1), 2)
    padval = jnp.where(cid >= C1h, NEG, 0.0).astype(f32)        # (1, 1, C1)

    # top/bottom pooled rows are padding rows on the first/last tile
    rid = lax.broadcasted_iota(jnp.int32, (TH + 1, 1, 1), 0)
    row_pad = ((rid == 0) & is_first) | ((rid == TH) & is_last)
    eE = jnp.where(row_pad, padval, eE)
    oE = jnp.where(row_pad, padval, oE)

    # ---- stride-2 column taps (pooled cols 2ow-1, 2ow, 2ow+1) ---------------
    def col_taps(ce, co):
        r = ce.shape[0]
        pc = jnp.broadcast_to(padval, (r, 1, C1))
        cof = jnp.concatenate([pc, co, pc], axis=1)              # (r, Wo+1, C1)
        return cof[:, 0:Wo], ce, cof[:, 1:Wo + 1]                # left, mid, right

    e_lt, e_md, e_rt = col_taps(eE, oE)                # (TH+1, Wo, C1)
    o_lt, o_md, o_rt = col_taps(eO, oO)                # (TH,   Wo, C1)

    def row_sel(arr_e, arr_o, kj):
        if kj == 0:
            return arr_e[0:TH]
        if kj == 1:
            return arr_o
        return arr_e[1:TH + 1]

    col_pairs = ((e_lt, o_lt), (e_md, o_md), (e_rt, o_rt))
    conv_feats = []
    mp = None
    for kj in range(3):                                # weight row order (kh, kw, ci)
        for ki in range(3):
            arr_e, arr_o = col_pairs[ki]
            tap = row_sel(arr_e, arr_o, kj)            # (TH, Wo, C1)
            conv_feats.append(tap[..., :C1h])          # conv branch taps (zero pad)
            m = tap[..., C1h:]                         # max branch taps (-inf pad)
            mp = m if mp is None else jnp.maximum(mp, m)

    # ---- one im2col slab and a single MXU matmul ----------------------------
    feats = jnp.concatenate(conv_feats + [mp], axis=-1)          # (TH, Wo, 10*C1h) f32
    K = 10 * C1h
    feats2 = feats.reshape(TH * Wo, K).astype(w_ref.dtype)       # bf16 MXU operand
    z = jnp.dot(feats2, w_ref[...], preferred_element_type=f32)  # (TH*Wo, C2) f32 acc
    z = z + b_ref[...].astype(f32)
    y = z * jax.nn.sigmoid(z)                                    # SiLU
    out_ref[0] = y.reshape(TH, Wo, C2).astype(out_ref.dtype)


def adown_prepare(w1, bn1, w2, bn2, eps=1e-5, mm_dtype=jnp.bfloat16):
    """Fold BN (eval mode) into the conv weights and pack both branches.

    Row order of the packed matrix: rows [0, 9*C1h) = cv1 taps ordered
    (kh, kw, ci); rows [9*C1h, 10*C1h) = cv2 (1x1).  Resolution independent.
    """
    def fold(w, bn):
        gamma, beta, mean, var = bn
        s = gamma / jnp.sqrt(var + eps)
        return w * s[:, None, None, None], beta - mean * s

    w1e, b1e = fold(w1, bn1)                 # (C2h, C1h, 3, 3), (C2h,)
    w2e, b2e = fold(w2, bn2)                 # (C2h, C1h, 1, 1), (C2h,)
    c2h, c1h = w1e.shape[:2]
    c2 = 2 * c2h
    w1rows = jnp.transpose(w1e, (2, 3, 1, 0)).reshape(9 * c1h, c2h)   # (kh,kw,ci,co)
    w2rows = w2e[:, :, 0, 0].T               # (C1h, C2h)
    wmat = jnp.zeros((10 * c1h, c2), jnp.float32)
    wmat = wmat.at[0:9 * c1h, 0:c2h].set(w1rows)
    wmat = wmat.at[9 * c1h:, c2h:].set(w2rows)
    bias = jnp.concatenate([b1e, b2e]).reshape(1, c2).astype(jnp.float32)
    return wmat.astype(mm_dtype), bias


def adown_pallas(x_nhwc, wmat, bias, *, row_tile=None):
    """x_nhwc: (N, H, W, C1) -> NHWC output (N, H/2, W/2, C2)."""
    N, H, W, C1 = x_nhwc.shape
    assert H % 2 == 0 and W % 2 == 0 and C1 % 2 == 0
    K, C2 = wmat.shape
    C1h = C1 // 2
    assert K == 10 * C1h
    Ho, Wo = H // 2, W // 2

    if row_tile is None:
        # target roughly M = TH*Wo ~ 256 MXU rows; TH must divide Ho.
        target = max(1, 256 // Wo)
        row_tile = 1
        for d in range(1, Ho + 1):
            if Ho % d == 0 and d <= target:
                row_tile = d
    TH = row_tile
    assert Ho % TH == 0
    n_tiles = Ho // TH

    # free, layout-preserving view: lanes become [even input cols | odd input cols]
    x2 = x_nhwc.reshape(N, H, Wo, 2 * C1)

    body_spec = pl.BlockSpec((1, 2 * TH, Wo, 2 * C1), lambda n, t: (n, t, 0, 0))
    top_spec = pl.BlockSpec(
        (1, 1, Wo, 2 * C1),
        lambda n, t: (n, jnp.maximum(2 * TH * t - 1, 0), 0, 0))
    bot_spec = pl.BlockSpec(
        (1, 1, Wo, 2 * C1),
        lambda n, t: (n, jnp.minimum(2 * TH * (t + 1), H - 1), 0, 0))
    w_spec = pl.BlockSpec((K, C2), lambda n, t: (0, 0))       # resident weights
    b_spec = pl.BlockSpec((1, C2), lambda n, t: (0, 0))       # resident bias
    out_spec = pl.BlockSpec((1, TH, Wo, C2), lambda n, t: (n, t, 0, 0))

    return pl.pallas_call(
        adown_kernel,
        out_shape=jax.ShapeDtypeStruct((N, Ho, Wo, C2), x_nhwc.dtype),
        grid_spec=pltpu.PrefetchScalarGridSpec(
            num_scalar_prefetch=0,
            grid=(N, n_tiles),
            in_specs=[body_spec, top_spec, bot_spec, w_spec, b_spec],
            out_specs=out_spec),
        compiler_params=pltpu.CompilerParams(
            dimension_semantics=("parallel", "parallel"),
            vmem_limit_bytes=32 * 1024 * 1024),
    )(x2, x2, x2, wmat, bias)


def adown_ref(x, w1, bn1, w2, bn2, eps=1e-5):
    """Pure-JAX reference mirroring the PyTorch forward (eval mode, NCHW)."""
    xp = lax.reduce_window(x, 0.0, lax.add, (1, 1, 2, 2), (1, 1, 1, 1),
                           'VALID') * 0.25
    c1 = x.shape[1]
    x1, x2 = xp[:, :c1 // 2], xp[:, c1 // 2:]

    def bn(y, params):
        g, b, m, v = params
        return (y - m[None, :, None, None]) * (
            g[None, :, None, None] / jnp.sqrt(v[None, :, None, None] + eps)
        ) + b[None, :, None, None]

    y1 = lax.conv_general_dilated(x1, w1, (2, 2), [(1, 1), (1, 1)],
                                  dimension_numbers=('NCHW', 'OIHW', 'NCHW'))
    y1 = bn(y1, bn1)
    y1 = y1 * jax.nn.sigmoid(y1)

    x2m = lax.reduce_window(x2, -jnp.inf, lax.max, (1, 1, 3, 3), (1, 1, 2, 2),
                            [(0, 0), (0, 0), (1, 1), (1, 1)])
    y2 = lax.conv_general_dilated(x2m, w2, (1, 1), 'VALID',
                                  dimension_numbers=('NCHW', 'OIHW', 'NCHW'))
    y2 = bn(y2, bn2)
    y2 = y2 * jax.nn.sigmoid(y2)
    return jnp.concatenate([y1, y2], axis=1)


if __name__ == "__main__":
    N, C1, H, W = 2, 16, 16, 16
    C2 = 16
    C1h, C2h = C1 // 2, C2 // 2

    key = jax.random.PRNGKey(0)
    ks = jax.random.split(key, 11)

    x = jax.random.normal(ks[0], (N, C1, H, W), jnp.float32)
    w1 = 0.3 * jax.random.normal(ks[1], (C2h, C1h, 3, 3), jnp.float32)
    w2 = 0.3 * jax.random.normal(ks[2], (C2h, C1h, 1, 1), jnp.float32)
    bn1 = (1.0 + 0.1 * jax.random.normal(ks[3], (C2h,), jnp.float32),   # gamma
           0.1 * jax.random.normal(ks[4], (C2h,), jnp.float32),          # beta
           0.1 * jax.random.normal(ks[5], (C2h,), jnp.float32),          # mean
           0.5 + jax.random.uniform(ks[6], (C2h,), jnp.float32))         # var
    bn2 = (1.0 + 0.1 * jax.random.normal(ks[7], (C2h,), jnp.float32),
           0.1 * jax.random.normal(ks[8], (C2h,), jnp.float32),
           0.1 * jax.random.normal(ks[9], (C2h,), jnp.float32),
           0.5 + jax.random.uniform(ks[10], (C2h,), jnp.float32))

    wmat, bias = adown_prepare(w1, bn1, w2, bn2)          # bf16 weights, f32 bias

    # Demo plumbing only: a real pipeline keeps activations NHWC end-to-end.
    x_nhwc = jnp.transpose(x, (0, 2, 3, 1))
    out_nhwc = jax.block_until_ready(
        adown_pallas(x_nhwc, wmat, bias, row_tile=4))     # 2 row tiles -> halo path

    ref = jax.block_until_ready(adown_ref(x, w1, bn1, w2, bn2))
    ref_nhwc = jnp.transpose(ref, (0, 2, 3, 1))

    assert out_nhwc.shape == ref_nhwc.shape == (N, H // 2, W // 2, C2), (
        out_nhwc.shape, ref_nhwc.shape)
    err = float(jnp.max(jnp.abs(out_nhwc - ref_nhwc)))
    # bf16 MXU operands vs f32 reference -> bf16-level tolerance.
    assert jnp.allclose(out_nhwc, ref_nhwc, rtol=2e-2, atol=5e-2), \
        f"max abs err {err}"
    print("KERNEL_OK")
</pallas_src>

<mosaic_0001>
module attributes {stable_mosaic.version = 11 : i64} {
  func.func @adown_kernel(%arg0: i32, %arg1: i32, %arg2: memref<1x8x8x32xf32, #tpu.memory_space<vmem>>, %arg3: memref<1x1x8x32xf32, #tpu.memory_space<vmem>>, %arg4: memref<1x1x8x32xf32, #tpu.memory_space<vmem>>, %arg5: memref<80x16xbf16, #tpu.memory_space<vmem>>, %arg6: memref<1x16xf32, #tpu.memory_space<vmem>>, %arg7: memref<1x4x8x16xf32, #tpu.memory_space<vmem>>) attributes {dimension_semantics = [#tpu.dimension_semantics<parallel>, #tpu.dimension_semantics<parallel>], iteration_bounds = array<i64: 2, 2>, scalar_prefetch = 0 : i64, scratch_operands = 0 : i64, tpu.core_type = #tpu.core_type<tc>, window_params = [{transform_indices = @transform_0, window_bounds = array<i64: 1, 8, 8, 32>}, {transform_indices = @transform_1, window_bounds = array<i64: 1, 1, 8, 32>}, {transform_indices = @transform_2, window_bounds = array<i64: 1, 1, 8, 32>}, {pipeline_mode = #tpu.pipeline_mode<synchronous>, transform_indices = @transform_3, window_bounds = array<i64: 80, 16>}, {pipeline_mode = #tpu.pipeline_mode<synchronous>, transform_indices = @transform_4, window_bounds = array<i64: 1, 16>}, {transform_indices = @transform_5, window_bounds = array<i64: 1, 4, 8, 16>}]} {
    %c0_i32 = arith.constant 0 : i32
    %0 = arith.cmpi eq, %arg1, %c0_i32 : i32
    %c1_i32 = arith.constant 1 : i32
    %1 = arith.cmpi eq, %arg1, %c1_i32 : i32
    %c0 = arith.constant 0 : index
    %c0_0 = arith.constant 0 : index
    %c0_1 = arith.constant 0 : index
    %c0_2 = arith.constant 0 : index
    %2 = vector.load %arg2[%c0, %c0_0, %c0_1, %c0_2] : memref<1x8x8x32xf32, #tpu.memory_space<vmem>>, vector<1x8x8x32xf32>
    %3 = vector.shape_cast %2 : vector<1x8x8x32xf32> to vector<8x8x32xf32>
    %c0_3 = arith.constant 0 : index
    %c0_4 = arith.constant 0 : index
    %c0_5 = arith.constant 0 : index
    %c0_6 = arith.constant 0 : index
    %4 = vector.load %arg3[%c0_3, %c0_4, %c0_5, %c0_6] : memref<1x1x8x32xf32, #tpu.memory_space<vmem>>, vector<1x1x8x32xf32>
    %5 = vector.shape_cast %4 : vector<1x1x8x32xf32> to vector<1x8x32xf32>
    %c0_7 = arith.constant 0 : index
    %c0_8 = arith.constant 0 : index
    %c0_9 = arith.constant 0 : index
    %c0_10 = arith.constant 0 : index
    %6 = vector.load %arg4[%c0_7, %c0_8, %c0_9, %c0_10] : memref<1x1x8x32xf32, #tpu.memory_space<vmem>>, vector<1x1x8x32xf32>
    %7 = vector.shape_cast %6 : vector<1x1x8x32xf32> to vector<1x8x32xf32>
    %8 = tpu.concatenate %5, %3, %7 in 0 : vector<1x8x32xf32>, vector<8x8x32xf32>, vector<1x8x32xf32> -> vector<10x8x32xf32>
    %9 = vector.shape_cast %8 : vector<10x8x32xf32> to vector<5x2x8x32xf32>
    %10 = vector.extract_strided_slice %9 {offsets = [0, 0, 0, 0], sizes = [5, 1, 8, 32], strides = [1, 1, 1, 1]} : vector<5x2x8x32xf32> to vector<5x1x8x32xf32>
    %11 = vector.shape_cast %10 : vector<5x1x8x32xf32> to vector<5x8x32xf32>
    %12 = vector.extract_strided_slice %9 {offsets = [0, 1, 0, 0], sizes = [5, 1, 8, 32], strides = [1, 1, 1, 1]} : vector<5x2x8x32xf32> to vector<5x1x8x32xf32>
    %13 = vector.shape_cast %12 : vector<5x1x8x32xf32> to vector<5x8x32xf32>
    %14 = vector.extract_strided_slice %11 {offsets = [0, 0, 0], sizes = [5, 8, 16], strides = [1, 1, 1]} : vector<5x8x32xf32> to vector<5x8x16xf32>
    %15 = vector.extract_strided_slice %11 {offsets = [0, 0, 16], sizes = [5, 8, 16], strides = [1, 1, 1]} : vector<5x8x32xf32> to vector<5x8x16xf32>
    %16 = vector.extract_strided_slice %13 {offsets = [0, 0, 0], sizes = [5, 8, 16], strides = [1, 1, 1]} : vector<5x8x32xf32> to vector<5x8x16xf32>
    %17 = vector.extract_strided_slice %13 {offsets = [0, 0, 16], sizes = [5, 8, 16], strides = [1, 1, 1]} : vector<5x8x32xf32> to vector<5x8x16xf32>
    %18 = arith.addf %14, %15 : vector<5x8x16xf32>
    %19 = arith.addf %16, %17 : vector<5x8x16xf32>
    %20 = arith.addf %18, %19 : vector<5x8x16xf32>
    %cst = arith.constant 2.500000e-01 : f32
    %21 = vector.broadcast %cst : f32 to vector<5x8x16xf32>
    %22 = arith.mulf %21, %20 : vector<5x8x16xf32>
    %23 = vector.extract_strided_slice %15 {offsets = [0, 0, 0], sizes = [5, 7, 16], strides = [1, 1, 1]} : vector<5x8x16xf32> to vector<5x7x16xf32>
    %24 = vector.extract_strided_slice %14 {offsets = [0, 1, 0], sizes = [5, 7, 16], strides = [1, 1, 1]} : vector<5x8x16xf32> to vector<5x7x16xf32>
    %25 = arith.addf %23, %24 : vector<5x7x16xf32>
    %26 = vector.extract_strided_slice %17 {offsets = [0, 0, 0], sizes = [5, 7, 16], strides = [1, 1, 1]} : vector<5x8x16xf32> to vector<5x7x16xf32>
    %27 = vector.extract_strided_slice %16 {offsets = [0, 1, 0], sizes = [5, 7, 16], strides = [1, 1, 1]} : vector<5x8x16xf32> to vector<5x7x16xf32>
    %28 = arith.addf %26, %27 : vector<5x7x16xf32>
    %29 = arith.addf %25, %28 : vector<5x7x16xf32>
    %cst_11 = arith.constant 2.500000e-01 : f32
    %30 = vector.broadcast %cst_11 : f32 to vector<5x7x16xf32>
    %31 = arith.mulf %30, %29 : vector<5x7x16xf32>
    %32 = vector.extract_strided_slice %13 {offsets = [0, 0, 0], sizes = [4, 8, 32], strides = [1, 1, 1]} : vector<5x8x32xf32> to vector<4x8x32xf32>
    %33 = vector.extract_strided_slice %11 {offsets = [1, 0, 0], sizes = [4, 8, 32], strides = [1, 1, 1]} : vector<5x8x32xf32> to vector<4x8x32xf32>
    %34 = vector.extract_strided_slice %32 {offsets = [0, 0, 0], sizes = [4, 8, 16], strides = [1, 1, 1]} : vector<4x8x32xf32> to vector<4x8x16xf32>
    %35 = vector.extract_strided_slice %32 {offsets = [0, 0, 16], sizes = [4, 8, 16], strides = [1, 1, 1]} : vector<4x8x32xf32> to vector<4x8x16xf32>
    %36 = vector.extract_strided_slice %33 {offsets = [0, 0, 0], sizes = [4, 8, 16], strides = [1, 1, 1]} : vector<4x8x32xf32> to vector<4x8x16xf32>
    %37 = vector.extract_strided_slice %33 {offsets = [0, 0, 16], sizes = [4, 8, 16], strides = [1, 1, 1]} : vector<4x8x32xf32> to vector<4x8x16xf32>
    %38 = arith.addf %34, %35 : vector<4x8x16xf32>
    %39 = arith.addf %36, %37 : vector<4x8x16xf32>
    %40 = arith.addf %38, %39 : vector<4x8x16xf32>
    %cst_12 = arith.constant 2.500000e-01 : f32
    %41 = vector.broadcast %cst_12 : f32 to vector<4x8x16xf32>
    %42 = arith.mulf %41, %40 : vector<4x8x16xf32>
    %43 = vector.extract_strided_slice %35 {offsets = [0, 0, 0], sizes = [4, 7, 16], strides = [1, 1, 1]} : vector<4x8x16xf32> to vector<4x7x16xf32>
    %44 = vector.extract_strided_slice %34 {offsets = [0, 1, 0], sizes = [4, 7, 16], strides = [1, 1, 1]} : vector<4x8x16xf32> to vector<4x7x16xf32>
    %45 = arith.addf %43, %44 : vector<4x7x16xf32>
    %46 = vector.extract_strided_slice %37 {offsets = [0, 0, 0], sizes = [4, 7, 16], strides = [1, 1, 1]} : vector<4x8x16xf32> to vector<4x7x16xf32>
    %47 = vector.extract_strided_slice %36 {offsets = [0, 1, 0], sizes = [4, 7, 16], strides = [1, 1, 1]} : vector<4x8x16xf32> to vector<4x7x16xf32>
    %48 = arith.addf %46, %47 : vector<4x7x16xf32>
    %49 = arith.addf %45, %48 : vector<4x7x16xf32>
    %cst_13 = arith.constant 2.500000e-01 : f32
    %50 = vector.broadcast %cst_13 : f32 to vector<4x7x16xf32>
    %51 = arith.mulf %50, %49 : vector<4x7x16xf32>
    %52 = tpu.iota {dimensions = array<i32: 2>} : vector<1x1x16xi32>
    %c8_i32 = arith.constant 8 : i32
    %53 = vector.broadcast %c8_i32 : i32 to vector<1x1x16xi32>
    %54 = arith.cmpi sge, %52, %53 : vector<1x1x16xi32>
    %cst_14 = arith.constant -3.40282347E+38 : f32
    %cst_15 = arith.constant 0.000000e+00 : f32
    %55 = vector.broadcast %cst_14 : f32 to vector<1x1x16xf32>
    %56 = vector.broadcast %cst_15 : f32 to vector<1x1x16xf32>
    %57 = arith.select %54, %55, %56 : vector<1x1x16xi1>, vector<1x1x16xf32>
    %58 = tpu.iota {dimensions = array<i32: 0>} : vector<5x1x1xi32>
    %c0_i32_16 = arith.constant 0 : i32
    %59 = vector.broadcast %c0_i32_16 : i32 to vector<5x1x1xi32>
    %60 = arith.cmpi eq, %58, %59 : vector<5x1x1xi32>
    %61 = vector.broadcast %0 : i1 to vector<5x1x1xi1>
    %62 = arith.andi %60, %61 : vector<5x1x1xi1>
    %c4_i32 = arith.constant 4 : i32
    %63 = vector.broadcast %c4_i32 : i32 to vector<5x1x1xi32>
    %64 = arith.cmpi eq, %58, %63 : vector<5x1x1xi32>
    %65 = vector.broadcast %1 : i1 to vector<5x1x1xi1>
    %66 = arith.andi %64, %65 : vector<5x1x1xi1>
    %67 = arith.ori %62, %66 : vector<5x1x1xi1>
    %68 = vector.shape_cast %67 : vector<5x1x1xi1> to vector<5x1x1xi1>
    %69 = vector.broadcast %68 : vector<5x1x1xi1> to vector<5x8x16xi1>
    %70 = vector.shape_cast %57 : vector<1x1x16xf32> to vector<1x1x16xf32>
    %71 = vector.broadcast %70 : vector<1x1x16xf32> to vector<5x8x16xf32>
    %72 = arith.select %69, %71, %22 : vector<5x8x16xi1>, vector<5x8x16xf32>
    %73 = vector.shape_cast %67 : vector<5x1x1xi1> to vector<5x1x1xi1>
    %74 = vector.broadcast %73 : vector<5x1x1xi1> to vector<5x7x16xi1>
    %75 = vector.shape_cast %57 : vector<1x1x16xf32> to vector<1x1x16xf32>
    %76 = vector.broadcast %75 : vector<1x1x16xf32> to vector<5x7x16xf32>
    %77 = arith.select %74, %76, %31 : vector<5x7x16xi1>, vector<5x7x16xf32>
    %78 = vector.shape_cast %57 : vector<1x1x16xf32> to vector<1x1x16xf32>
    %79 = vector.broadcast %78 : vector<1x1x16xf32> to vector<5x1x16xf32>
    %80 = tpu.concatenate %79, %77, %79 in 1 : vector<5x1x16xf32>, vector<5x7x16xf32>, vector<5x1x16xf32> -> vector<5x9x16xf32>
    %81 = vector.extract_strided_slice %80 {offsets = [0, 0, 0], sizes = [5, 8, 16], strides = [1, 1, 1]} : vector<5x9x16xf32> to vector<5x8x16xf32>
    %82 = vector.extract_strided_slice %80 {offsets = [0, 1, 0], sizes = [5, 8, 16], strides = [1, 1, 1]} : vector<5x9x16xf32> to vector<5x8x16xf32>
    %83 = vector.shape_cast %57 : vector<1x1x16xf32> to vector<1x1x16xf32>
    %84 = vector.broadcast %83 : vector<1x1x16xf32> to vector<4x1x16xf32>
    %85 = tpu.concatenate %84, %51, %84 in 1 : vector<4x1x16xf32>, vector<4x7x16xf32>, vector<4x1x16xf32> -> vector<4x9x16xf32>
    %86 = vector.extract_strided_slice %85 {offsets = [0, 0, 0], sizes = [4, 8, 16], strides = [1, 1, 1]} : vector<4x9x16xf32> to vector<4x8x16xf32>
    %87 = vector.extract_strided_slice %85 {offsets = [0, 1, 0], sizes = [4, 8, 16], strides = [1, 1, 1]} : vector<4x9x16xf32> to vector<4x8x16xf32>
    %88 = vector.extract_strided_slice %81 {offsets = [0, 0, 0], sizes = [4, 8, 16], strides = [1, 1, 1]} : vector<5x8x16xf32> to vector<4x8x16xf32>
    %89 = vector.extract_strided_slice %88 {offsets = [0, 0, 0], sizes = [4, 8, 8], strides = [1, 1, 1]} : vector<4x8x16xf32> to vector<4x8x8xf32>
    %90 = vector.extract_strided_slice %88 {offsets = [0, 0, 8], sizes = [4, 8, 8], strides = [1, 1, 1]} : vector<4x8x16xf32> to vector<4x8x8xf32>
    %91 = vector.extract_strided_slice %72 {offsets = [0, 0, 0], sizes = [4, 8, 16], strides = [1, 1, 1]} : vector<5x8x16xf32> to vector<4x8x16xf32>
    %92 = vector.extract_strided_slice %91 {offsets = [0, 0, 0], sizes = [4, 8, 8], strides = [1, 1, 1]} : vector<4x8x16xf32> to vector<4x8x8xf32>
    %93 = vector.extract_strided_slice %91 {offsets = [0, 0, 8], sizes = [4, 8, 8], strides = [1, 1, 1]} : vector<4x8x16xf32> to vector<4x8x8xf32>
    %94 = arith.maximumf %90, %93 : vector<4x8x8xf32>
    %95 = vector.extract_strided_slice %82 {offsets = [0, 0, 0], sizes = [4, 8, 16], strides = [1, 1, 1]} : vector<5x8x16xf32> to vector<4x8x16xf32>
    %96 = vector.extract_strided_slice %95 {offsets = [0, 0, 0], sizes = [4, 8, 8], strides = [1, 1, 1]} : vector<4x8x16xf32> to vector<4x8x8xf32>
    %97 = vector.extract_strided_slice %95 {offsets = [0, 0, 8], sizes = [4, 8, 8], strides = [1, 1, 1]} : vector<4x8x16xf32> to vector<4x8x8xf32>
    %98 = arith.maximumf %94, %97 : vector<4x8x8xf32>
    %99 = vector.extract_strided_slice %86 {offsets = [0, 0, 0], sizes = [4, 8, 8], strides = [1, 1, 1]} : vector<4x8x16xf32> to vector<4x8x8xf32>
    %100 = vector.extract_strided_slice %86 {offsets = [0, 0, 8], sizes = [4, 8, 8], strides = [1, 1, 1]} : vector<4x8x16xf32> to vector<4x8x8xf32>
    %101 = arith.maximumf %98, %100 : vector<4x8x8xf32>
    %102 = vector.extract_strided_slice %42 {offsets = [0, 0, 0], sizes = [4, 8, 8], strides = [1, 1, 1]} : vector<4x8x16xf32> to vector<4x8x8xf32>
    %103 = vector.extract_strided_slice %42 {offsets = [0, 0, 8], sizes = [4, 8, 8], strides = [1, 1, 1]} : vector<4x8x16xf32> to vector<4x8x8xf32>
    %104 = arith.maximumf %101, %103 : vector<4x8x8xf32>
    %105 = vector.extract_strided_slice %87 {offsets = [0, 0, 0], sizes = [4, 8, 8], strides = [1, 1, 1]} : vector<4x8x16xf32> to vector<4x8x8xf32>
    %106 = vector.extract_strided_slice %87 {offsets = [0, 0, 8], sizes = [4, 8, 8], strides = [1, 1, 1]} : vector<4x8x16xf32> to vector<4x8x8xf32>
    %107 = arith.maximumf %104, %106 : vector<4x8x8xf32>
    %108 = vector.extract_strided_slice %81 {offsets = [1, 0, 0], sizes = [4, 8, 16], strides = [1, 1, 1]} : vector<5x8x16xf32> to vector<4x8x16xf32>
    %109 = vector.extract_strided_slice %108 {offsets = [0, 0, 0], sizes = [4, 8, 8], strides = [1, 1, 1]} : vector<4x8x16xf32> to vector<4x8x8xf32>
    %110 = vector.extract_strided_slice %108 {offsets = [0, 0, 8], sizes = [4, 8, 8], strides = [1, 1, 1]} : vector<4x8x16xf32> to vector<4x8x8xf32>
    %111 = arith.maximumf %107, %110 : vector<4x8x8xf32>
    %112 = vector.extract_strided_slice %72 {offsets = [1, 0, 0], sizes = [4, 8, 16], strides = [1, 1, 1]} : vector<5x8x16xf32> to vector<4x8x16xf32>
    %113 = vector.extract_strided_slice %112 {offsets = [0, 0, 0], sizes = [4, 8, 8], strides = [1, 1, 1]} : vector<4x8x16xf32> to vector<4x8x8xf32>
    %114 = vector.extract_strided_slice %112 {offsets = [0, 0, 8], sizes = [4, 8, 8], strides = [1, 1, 1]} : vector<4x8x16xf32> to vector<4x8x8xf32>
    %115 = arith.maximumf %111, %114 : vector<4x8x8xf32>
    %116 = vector.extract_strided_slice %82 {offsets = [1, 0, 0], sizes = [4, 8, 16], strides = [1, 1, 1]} : vector<5x8x16xf32> to vector<4x8x16xf32>
    %117 = vector.extract_strided_slice %116 {offsets = [0, 0, 0], sizes = [4, 8, 8], strides = [1, 1, 1]} : vector<4x8x16xf32> to vector<4x8x8xf32>
    %118 = vector.extract_strided_slice %116 {offsets = [0, 0, 8], sizes = [4, 8, 8], strides = [1, 1, 1]} : vector<4x8x16xf32> to vector<4x8x8xf32>
    %119 = arith.maximumf %115, %118 : vector<4x8x8xf32>
    %120 = tpu.concatenate %89, %92, %96, %99, %102, %105, %109, %113, %117, %119 in 2 : vector<4x8x8xf32>, vector<4x8x8xf32>, vector<4x8x8xf32>, vector<4x8x8xf32>, vector<4x8x8xf32>, vector<4x8x8xf32>, vector<4x8x8xf32>, vector<4x8x8xf32>, vector<4x8x8xf32>, vector<4x8x8xf32> -> vector<4x8x80xf32>
    %121 = vector.shape_cast %120 : vector<4x8x80xf32> to vector<32x80xf32>
    %122 = arith.truncf %121 : vector<32x80xf32> to vector<32x80xbf16>
    %c0_17 = arith.constant 0 : index
    %c0_18 = arith.constant 0 : index
    %123 = vector.load %arg5[%c0_17, %c0_18] : memref<80x16xbf16, #tpu.memory_space<vmem>>, vector<80x16xbf16>
    %cst_19 = arith.constant dense<0.000000e+00> : vector<32x16xf32>
    %124 = tpu.matmul %122, %123, %cst_19 {dimension_numbers = #tpu.dot_dimension_numbers<[1], [0], [0], [1], [0, 0, 1, 1], [], []>} : vector<32x80xbf16>, vector<80x16xbf16>, vector<32x16xf32> -> vector<32x16xf32>
    %c0_20 = arith.constant 0 : index
    %c0_21 = arith.constant 0 : index
    %125 = vector.load %arg6[%c0_20, %c0_21] : memref<1x16xf32, #tpu.memory_space<vmem>>, vector<1x16xf32>
    %126 = vector.broadcast %125 : vector<1x16xf32> to vector<32x16xf32>
    %127 = arith.addf %124, %126 : vector<32x16xf32>
    %128 = arith.negf %127 : vector<32x16xf32>
    %129 = math.exp %128 : vector<32x16xf32>
    %cst_22 = arith.constant 1.000000e+00 : f32
    %130 = vector.broadcast %cst_22 : f32 to vector<32x16xf32>
    %131 = arith.addf %130, %129 : vector<32x16xf32>
    %132 = arith.divf %130, %131 : vector<32x16xf32>
    %133 = arith.mulf %127, %132 : vector<32x16xf32>
    %134 = vector.shape_cast %133 : vector<32x16xf32> to vector<4x8x16xf32>
    %c0_23 = arith.constant 0 : index
    %c0_24 = arith.constant 0 : index
    %c0_25 = arith.constant 0 : index
    %c0_26 = arith.constant 0 : index
    %135 = vector.load %arg7[%c0_23, %c0_24, %c0_25, %c0_26] : memref<1x4x8x16xf32, #tpu.memory_space<vmem>>, vector<1x4x8x16xf32>
    %136 = vector.shape_cast %135 : vector<1x4x8x16xf32> to vector<4x8x16xf32>
    %137 = vector.shape_cast %134 : vector<4x8x16xf32> to vector<1x4x8x16xf32>
    tpu.vector_store %arg7[%c0_23, %c0_24, %c0_25, %c0_26], %137 {strides = array<i32>} : memref<1x4x8x16xf32, #tpu.memory_space<vmem>>, vector<1x4x8x16xf32>,
    return
  }
  func.func @transform_0(%arg0: i32, %arg1: i32) -> (i32, i32, i32, i32) {
    %c0_i32 = arith.constant 0 : i32
    %c0_i32_0 = arith.constant 0 : i32
    %c0_i32_1 = arith.constant 0 : i32
    return %arg0, %arg1, %c0_i32, %c0_i32_0 : i32, i32, i32, i32
  }
  func.func @transform_1(%arg0: i32, %arg1: i32) -> (i32, i32, i32, i32) {
    %c8_i32 = arith.constant 8 : i32
    %0 = arith.muli %c8_i32, %arg1 : i32
    %c1_i32 = arith.constant 1 : i32
    %1 = arith.subi %0, %c1_i32 : i32
    %c0_i32 = arith.constant 0 : i32
    %2 = arith.maxsi %1, %c0_i32 : i32
    %c0_i32_0 = arith.constant 0 : i32
    %c0_i32_1 = arith.constant 0 : i32
    %c0_i32_2 = arith.constant 0 : i32
    return %arg0, %2, %c0_i32_0, %c0_i32_1 : i32, i32, i32, i32
  }
  func.func @transform_2(%arg0: i32, %arg1: i32) -> (i32, i32, i32, i32) {
    %c1_i32 = arith.constant 1 : i32
    %0 = arith.addi %arg1, %c1_i32 : i32
    %c8_i32 = arith.constant 8 : i32
    %1 = arith.muli %c8_i32, %0 : i32
    %c15_i32 = arith.constant 15 : i32
    %2 = arith.minsi %1, %c15_i32 : i32
    %c0_i32 = arith.constant 0 : i32
    %c0_i32_0 = arith.constant 0 : i32
    %c0_i32_1 = arith.constant 0 : i32
    return %arg0, %2, %c0_i32, %c0_i32_0 : i32, i32, i32, i32
  }
  func.func @transform_3(%arg0: i32, %arg1: i32) -> (i32, i32) {
    %c0_i32 = arith.constant 0 : i32
    %c0_i32_0 = arith.constant 0 : i32
    %c0_i32_1 = arith.constant 0 : i32
    return %c0_i32, %c0_i32_0 : i32, i32
  }
  func.func @transform_4(%arg0: i32, %arg1: i32) -> (i32, i32) {
    %c0_i32 = arith.constant 0 : i32
    %c0_i32_0 = arith.constant 0 : i32
    %c0_i32_1 = arith.constant 0 : i32
    return %c0_i32, %c0_i32_0 : i32, i32
  }
  func.func @transform_5(%arg0: i32, %arg1: i32) -> (i32, i32, i32, i32) {
    %c0_i32 = arith.constant 0 : i32
    %c0_i32_0 = arith.constant 0 : i32
    %c0_i32_1 = arith.constant 0 : i32
    return %arg0, %arg1, %c0_i32, %c0_i32_0 : i32, i32, i32, i32
  }
}

</mosaic_0001>

<bundles_post_ra>
// kernel: tpu_custom_call.1
= control target key start
LH: loop header
LB: loop body
LE: loop exit
PB: predicated region body
PF: predicated region fallthrough
CT: control target
= control target key end

     0   :  { %s2489_s0 = inlined_call_operand.hbm [shape: f32[2,16,8,32], index: 0, kind: input, shape index: {}]   ;;  %s2490_s1 = inlined_call_operand.hbm [shape: f32[2,16,8,32], index: 1, kind: input, shape index: {}]   ;;  %s2491_s2 = inlined_call_operand.hbm [shape: f32[2,16,8,32], index: 2, kind: input, shape index: {}]   ;;  %s2492_s3 = inlined_call_operand.vmem [shape: bf16[80,16], index: 3, kind: input, shape index: {}]   ;;  %s2493_s4 = inlined_call_operand.vmem [shape: f32[1,16], index: 4, kind: input, shape index: {}]   ;;  %s2494_s5 = inlined_call_operand.hbm [shape: f32[2,8,8,16], index: 5, kind: output, shape index: {}]  }
   0x1   :  { %2508 = sst [smem:[#allocation25_spill]] %s2489_s0 }
   0x2   :  { %2509 = sst [smem:[#allocation26_spill]] %s2490_s1 }
   0x3   :  { %2510 = sst [smem:[#allocation27_spill]] %s2492_s3 }
   0x4   :  { %2511 = sst [smem:[#allocation28_spill]] %s2493_s4 }
   0x5   :  { %2512 = sst [smem:[#allocation29_spill]] %s2494_s5 }
   0x6   :  { %10 = vsyncpa [#allocation3], 0 }
   0x7   :  { %12 = vsyncpa [#allocation3 + $0x1], 0 }
   0x8   :  { %13 = vsyncpa [#allocation6], 0 }
   0x9   :  { %15 = vsyncpa [#allocation6 + $0x1], 0 }
   0xa   :  { %16 = vsyncpa [#allocation4], 0 }
   0xb   :  { %18 = vsyncpa [#allocation4 + $0x1], 0  ;;  %s1807_s18 = smov 0   ;;  %s1809_s19 = smov 0  }
   0xc   :  { %s1811_s20 = smov 0   ;;  %s1813_s21 = smov 0  }
   0xd   :  { %s1815_s22 = smov 0   ;;  %s1817_s23 = smov 0  }
   0xe   :  { %s1819_s24 = smov 0   ;;  %s1821_s25 = smov 0  }
   0xf   :  { %s1823_s26 = smov 0   ;;  %s1825_s27 = smov 0  }
  0x10   :  { %s1827_s28 = smov 0   ;;  %s1829_s29 = smov 0  }
  0x11   :  { %s1831_s30 = smov 0   ;;  %s1833_s6 = smov 0  }
  0x12 LB: > { %2513 = sst [smem:[#allocation13_spill]] %s1730_s23  ;;  %s1878_s7 = sadd.s32 4294967295, %s1762_s6   ;;  %s1762_s6 = sphi %s1833_s6, %s24_s6   ;;  %s1758_s30 = sphi %s1831_s30, %s2569_s30   ;;  %s1754_s29 = sphi %s1829_s29, %s2568_s29   ;;  %s1750_s28 = sphi %s1827_s28, %s2567_s28   ;;  %s1746_s27 = sphi %s1825_s27, %s2556_s27   ;;  %s1742_s26 = sphi %s1823_s26, %s2555_s26   ;;  %s1738_s25 = sphi %s1821_s25, %s2566_s25   ;;  %s1734_s24 = sphi %s1819_s24, %s2565_s24   ;;  %s1730_s23 = sphi %s1817_s23, %s2553_s23   ;;  %s1726_s22 = sphi %s1815_s22, %s2564_s22   ;;  %s1722_s21 = sphi %s1813_s21, %s2563_s21   ;;  %s1718_s20 = sphi %s1811_s20, %s2562_s20   ;;  %s1714_s19 = sphi %s1809_s19, %s2561_s19   ;;  %s1710_s18 = sphi %s1807_s18, %s2560_s18  }
  0x13   : > { %2514 = sst [smem:[#allocation14_spill]] %s1742_s26  ;;  %s33_s8 = sadd.s32 1, %s1754_s29 }
  0x14   : > { %2515 = sst [smem:[#allocation15_spill]] %s1746_s27  ;;  %p34_p0 = scmp.ge.s32.totalorder %s33_s8, 2 }
  0x15   : > { %2516 = sst [smem:[#allocation16_spill]] %s1750_s28  ;;  %s36_s9 = sadd.s32 1, %s1758_s30 }
  0x16   : > { %2517 = sst [smem:[#allocation17_spill]] %s1754_s29  ;;  %p53_p1 = scmp.eq.s32.totalorder %s1762_s6, 0 }
  0x17   : > { %2518 = sst [smem:[#allocation18_spill]] %s1758_s30  ;;  %p59_p2 = scmp.eq.s32.totalorder %s1878_s7, 0 }
  0x18   : > { %s2571_s8 = smov (%p34_p0, %s33_s8), 0  ;;  %s2573_s9 = smov (!%p34_p0, %s36_s9), %s1758_s30 }
  0x19   : > { %2519 = sst [smem:[#allocation19_spill]] %s2571_s8  ;;  %s41_s10 = ssub.s32 %s1754_s29, %s2571_s8 }
  0x1a   : > { %s1890_s11 = sshll.u32 %s1754_s29, 3  ;;  %p38_p3 = scmp.ge.s32.totalorder %s2573_s9, 2 }
  0x1b   : > { %s1169_s12 = sadd.s32 4294967295, %s1890_s11  ;;  %s1170_s13 = sshll.u32 %s2571_s8, 3 }
  0x1c   : > { %p70_p4 = scmp.gt.s32.totalorder %s1169_s12, 0  ;;  %s2575_s9 = smov (%p38_p3, %s2573_s9), 0 }
  0x1d   : > { %2520 = sst [smem:[#allocation20_spill]] %s2575_s9  ;;  %s1898_s14 = ssub.s32 %s1758_s30, %s2575_s9 }
  0x1e   : > { %s2577_s12 = smov (!%p70_p4, %s1169_s12), 0  ;;  %s1171_s15 = sadd.s32 4294967295, %s1170_s13 }
  0x1f   : > { %s1901_s16 = sor.u32 %s41_s10, %s1898_s14  ;;  %p74_p5 = scmp.gt.s32.totalorder %s1171_s15, 0 }
  0x20   : > { %p43_p6 = scmp.eq.s32.totalorder %s1901_s16, 0  ;;  %s81_s17 = sadd.s32 1, %s1730_s23 }
  0x21   : > { %s2579_s15 = smov (!%p74_p5, %s1171_s15), 0  ;;  %p88_p7 = scmp.ne.s32.totalorder %s1730_s23, %s1726_s22 }
  0x22   : > { %p94_p8 = scmp.ne.s32.totalorder %s1726_s22, %s1722_s21  ;;  %s77_s9 = ssub.s32 %s2577_s12, %s2579_s15 }
  0x23   : > { %s1909_s8 = sadd.s32 8, %s1170_s13  ;;  %s78_s29 = sor.u32 %s77_s9, %s1898_s14 }
  0x24   : > { %p1914_p9 = por %p88_p7, %p53_p1  ;;  %p79_p10 = scmp.eq.s32.totalorder %s78_s29, 0 }
  0x25   : > { %p1920_p11 = por %p94_p8, %p59_p2  ;;  %p2506_p13 = scmp.lt.s32.totalorder %s1762_s6, 4 }
  0x26   : > { %s1926_s21 = scalar_select %p79_p10, %s1730_s23, %s81_s17  }
  0x27   : > { %s2522_s5 = scalar_select %p1920_p11, 1, 0 }
  0x28   : > { %2524 = sst [smem:[#allocation22_spill]] %s1926_s21  ;;  %s1930_s9 = sshll.u32 %s1758_s30, 4 }
  0x29   : > { %2523 = sst [smem:[#allocation21_spill]] %s2522_s5  ;;  %s254_s15 = sand.u32 1, %s1762_s6  }
  0x2a   : > { %s256_s29 = sand.u32 1, %s1730_s23   ;;  %s266_s4 = sadd.s32 %s1930_s9, %s2577_s12 }
  0x2b   : > { %s1180_s28 = sshll.u32 %s256_s29, 3  ;;  %s1184_s3 = sshll.u32 %s266_s4, 3 }
  0x2c   : > { %s2525_s1 = sld [smem:[#allocation26_spill]]  ;;  %s258_s30 = scalar_lea.vmem [#allocation5], %s1180_s28 }
  0x2d   : > { %s272_s13 = sshll.u32 %s258_s30, 4  ;;  %p1254_p0 = pnand %p2506_p13, %p1914_p9  ;;  %s273_s13 = int_to_ptr.vmem [resolvable:$true] %s272_s13 }
  0x2e   : > { %p1189_p3 = scmp.ge.s32.totalorder %s1762_s6, 1  ;;  %p302_p4 = scmp.lt.s32.totalorder %s1762_s6, 5 }
  0x2f   : > { %s1946_s4 = scalar_lea.sflag [#allocation6], %s254_s15  ;;  %s1167_s27 = sadd.s32 4294967294, %s1762_s6  }
  0x30   : > { %p1949_p5 = pnand %p1189_p3, %p302_p4  ;;  %s45_s28 = sadd.s32 1, %s1742_s26 }
  0x31   : > { %s1958_s30 = scalar_select %p43_p6, %s1742_s26, %s45_s28  }
  0x32   : > { %s268_s21 = scalar_lea.hbm %s2525_s1, %s1184_s3  ;;  %p52_p7 = scmp.ne.s32.totalorder %s1742_s26, %s1738_s25 }
  0x33   : > { %s270_s5 = sshll.u32 %s268_s21, 4  ;;  %2527 = sst [smem:[#allocation23_spill]] %s1958_s30  ;;  %s271_s5 = int_to_ptr.hbm [resolvable:$true] %s270_s5 }
  0x34   : > { %1256 = dma.hbm_to_vmem [thread:$0]  (!%p1254_p0), %s271_s5, 128, %s273_s13, %s1946_s4  }
  0x35   : > { %p58_p8 = scmp.ne.s32.totalorder %s1738_s25, %s1734_s24  ;;  %p198_p9 = scmp.eq.s32.totalorder %s1878_s7, 3 }
  0x36   : > { %p204_p10 = scmp.eq.s32.totalorder %s1167_s27, 3  ;;  %p1967_p12 = por %p53_p1, %p52_p7 }
  0x37   : > { %p1973_p0 = por %p59_p2, %p58_p8  ;;  %p1977_p3 = por %p198_p9, %p52_p7 }
  0x38   : > { %p1981_p6 = por %p204_p10, %p58_p8  ;;  %s230_s21 = sand.u32 1, %s1742_s26  }
  0x39   : > { %s2533_s13 = sadd.s32 %s1930_s9, %s1890_s11  ;;  %s1176_s29 = sshll.u32 %s230_s21, 6 }
  0x3a   : > { %s2531_s10 = scalar_select %p1981_p6, 1, 0 }
  0x3b   : > { %s1179_s15 = sshll.u32 %s2533_s13, 3  ;;  %s2534_s0 = sld [smem:[#allocation25_spill]] }
  0x3c   : > { %2532 = sst [smem:[#allocation24_spill]] %s2531_s10  ;;  %s234_s30 = scalar_lea.vmem [#allocation2], %s1176_s29 }
  0x3d   : > { %s244_s23 = sshll.u32 %s234_s30, 4  ;;  %p1251_p4 = pnand %p2506_p13, %p1967_p12  ;;  %s245_s23 = int_to_ptr.vmem [resolvable:$true] %s244_s23 }
  0x3e   : > { %s231_s13 = scalar_lea.sflag [#allocation3], %s230_s21  ;;  %s1764_s26 = smov 128  }
  0x3f   : > { %s1765_s17 = smov 8   ;;  %s117_s27 = sadd.s32 1, %s1718_s20 }
  0x40   : > { %p124_p8 = scmp.ne.s32.totalorder %s1718_s20, %s1714_s19  ;;  %p2535_p9 = scmp.lt.s32.totalorder %s1909_s8, 15 }
  0x41   : > { %s241_s28 = scalar_lea.hbm %s2534_s0, %s1179_s15  ;;  %s1227_s15 = sadd.s32 8, %s1890_s11 }
  0x42   : > { %s242_s1 = sshll.u32 %s241_s28, 4  ;;  %p106_p7 = scmp.lt.s32.totalorder %s1227_s15, 15  ;;  %s243_s1 = int_to_ptr.hbm [resolvable:$true] %s242_s1 }
  0x43   : > { %1253 = dma.hbm_to_vmem [thread:$0]  (!%p1251_p4), %s243_s1, 1024, %s245_s23, %s231_s13, %s1764_s26, %s1764_s26, %s1765_s17  }
  0x44   : > { %s2581_s8 = smov (!%p2535_p9, %s1909_s8), 15  ;;  %s2583_s15 = smov (!%p106_p7, %s1227_s15), 15 }
  0x45   : > { %p2005_p10 = por %p124_p8, %p53_p1  ;;  %p130_p12 = scmp.ne.s32.totalorder %s1714_s19, %s1710_s18 }
  0x46   : > { %s113_s12 = ssub.s32 %s2583_s15, %s2581_s8  ;;  %s281_s21 = sand.u32 1, %s1718_s20  }
  0x47   : > { %s114_s1 = sor.u32 %s113_s12, %s1898_s14  ;;  %p2015_p4 = por %p130_p12, %p59_p2 }
  0x48   : > { %p115_p13 = scmp.eq.s32.totalorder %s114_s1, 0  ;;  %s1185_s26 = sshll.u32 %s281_s21, 3 }
  0x49   : > { %s291_s11 = sadd.s32 %s1930_s9, %s2583_s15  ;;  %s283_s13 = scalar_lea.vmem [#allocation7], %s1185_s26 }
  0x4a   : > { %s2021_s29 = scalar_select %p115_p13, %s1718_s20, %s117_s27  }
  0x4b   : > { %s1188_s28 = sshll.u32 %s291_s11, 3  ;;  %s297_s17 = sshll.u32 %s283_s13, 4  ;;  %s298_s17 = int_to_ptr.vmem [resolvable:$true] %s297_s17 }
  0x4c   : > { %s293_s18 = scalar_lea.hbm %s2491_s2, %s1188_s28  ;;  %p2538_p1 = scmp.lt.s32.totalorder %s1762_s6, 4 }
  0x4d   : > { %s295_s8 = sshll.u32 %s293_s18, 4  ;;  %306 = sbr.rel (%p1949_p5) target bundleno = 694 (0x2b6), region = 40  ;;  %s296_s8 = int_to_ptr.hbm [resolvable:$true] %s295_s8 }
  0x4e   : > { %p1257_p2 = pnand %p2538_p1, %p2005_p10  ;;  %s2034_s14 = sand.u32 (!%p1949_p5), 1, %s1738_s25  }
  0x4f   : > { %s1190_s9 = sshll.u32 (!%p1949_p5), %s2034_s14, 6  ;;  %s309_s15 = scalar_lea.sflag (!%p1949_p5), [#allocation3], %s2034_s14 }
  0x50   : > { %1259 = dma.hbm_to_vmem [thread:$0]  (!%p1257_p2), %s296_s8, 128, %s298_s17, %s1946_s4  }
  0x51   : > { %s2038_s0 = scalar_lea.vmem (!%p1949_p5), [#allocation2], %s1190_s9 }
  0x52   : > { %1693 = dma.done.wait (%p1973_p0), %s309_s15, 1024  }
  0x53   : > { %1695 = vsyncadd (%p1973_p0), %s309_s15, 4294966272  ;;  %s318_s3 = sand.u32 1, %s1878_s7   ;;  %s320_s10 = sand.u32 1, %s1726_s22  }
  0x54   : > { %s1191_s27 = sshll.u32 %s320_s10, 3  ;;  %s319_s30 = scalar_lea.sflag [#allocation6], %s318_s3 }
  0x55   : > { %s322_s12 = scalar_lea.vmem [#allocation5], %s1191_s27 }
  0x56   : > { %1697 = dma.done.wait (%p1920_p11), %s319_s30, 128  }
  0x57   : > { %1699 = vsyncadd (%p1920_p11), %s319_s30, 4294967168  ;;  %s330_s21 = sand.u32 1, %s1714_s19  }
  0x58   : > { %s2051_s1 = sshll.u32 %s330_s21, 3 }
  0x59   : > { %s332_s5 = scalar_lea.vmem [#allocation7], %s2051_s1 }
  0x5a   : > { %1701 = dma.done.wait (%p2015_p4), %s319_s30, 128  }
  0x5b   : > { %1703 = vsyncadd (%p2015_p4), %s319_s30, 4294967168  ;;  %v2058_v0 = vld [vmem:[%s322_s12] sm:$0xff]  ;;  %s1766_s7 = smov 16   ;;  %v2072_v6 = vld [vmem:[%s2038_s0 + $0x18] sm:$0xff]  ;;  %s1767_s23 = smov 112   ;;  %vm588_vm3 = vcmask 1040384  }
  0x5c   : > { %v2061_v1 = vld [vmem:[%s2038_s0 + $0x8] sm:$0xff]  ;;  %v453_v2 = vrot.slane %v2058_v0, 1  ;;  %v2075_v7 = vld [vmem:[%s2038_s0] sm:$0xff]  ;;  %v2079_v8 = vld [vmem:[%s2038_s0 + $0x10] sm:$0xff]  ;;  %v455_v9 = vrot.slane %v2072_v6, 1  ;;  %s2540_s26 = sld [smem:[#allocation15_spill]] }
  0x5d   : > { %v454_v3 = vrot.slane %v2061_v1, 1  ;;  %v2066_v4 = vld [vmem:[%s2038_s0 + $0x28] sm:$0xff]  ;;  %v478_v10 = vrot.slane %v2075_v7, 1  ;;  %v479_v11 = vrot.slane %v2079_v8, 1  ;;  %v2087_v12 = vld [vmem:[%s2038_s0 + $0x30] sm:$0xff]  ;;  %v2090_v13 = vld [vmem:[%s2038_s0 + $0x20] sm:$0xff] }
  0x5e   : > { %v456_v5 = vrot.slane %v2066_v4, 1  ;;  %458 = vrot.lane.b32.xlu0 %v453_v2, %s1766_s7  ;;  %v2094_v14 = vld [vmem:[%s2038_s0 + $0x38] sm:$0xff]  ;;  %v481_v15 = vrot.slane %v2087_v12, 1  ;;  %v480_v16 = vrot.slane %v2090_v13, 1  ;;  %s1769_s28 = smov 8   ;;  %s1770_s13 = smov 32  }
  0x5f   : > { %460 = vrot.lane.b32.xlu1 %v454_v3, %s1766_s7  ;;  %v457_v17 = vrot.slane %v2094_v14, 1  ;;  %v2103_v18 = vld [vmem:[%s332_s5] sm:$0xff]  ;;  %s1771_s17 = smov 56   ;;  %vm627_vm4 = vcmask 1046528   ;;  %s1772_s8 = smov 24   ;;  %vm810_vm5 = vcmask 64512  }
  0x60   : > { %464 = vrot.lane.b32.xlu2 %v456_v5, %s1766_s7  ;;  %v482_v19 = vrot.slane %v2103_v18, 1  ;;  %s1773_s9 = smov 48   ;;  %s1774_s15 = smov 40   ;;  %vm815_vm6 = vcmask 130048   ;;  %vm820_vm7 = vcmask 195584   ;;  %vm825_vm8 = vcmask 261120  }
  0x61   : > { %s1775_s0 = smov 64   ;;  %s2545_s10 = sld [smem:[#allocation27_spill]]  ;;  %vm830_vm9 = vcmask 326656   ;;  %vm835_vm10 = vcmask 392192   ;;  %vm840_vm11 = vcmask 457728   ;;  %vm845_vm12 = vcmask 523264  }
  0x62   : > { %p381_p11 = scmp.eq.s32.totalorder %s2540_s26, 0  ;;  %p382_p13 = scmp.eq.s32.totalorder %s2540_s26, 1  ;;  %vm850_vm13 = vcmask 588800   ;;  %vm901_vm14 = vcmask 654336  }
  0x63   : > { %s2548_s30 = sld [smem:[#allocation29_spill]] }
  0x64   : > { %s533_s11 = scalar_select %p381_p11, 1, 0 }
  0x65   : > { %s536_s18 = scalar_select %p382_p13, 1, 0 }
  0x66   : > { %483 = vrot.lane.b32.xlu0 %v478_v10, %s1766_s7  ;;  %v529_v10 = vlaneseq }
  0x67   : > { %462 = vrot.lane.b32.xlu1 %v455_v9, %s1766_s7 }
  0x68   : > { %485 = vrot.lane.b32.xlu2 %v479_v11, %s1766_s7 }
  0x69   : > { %s2549_s12 = smov %s2548_s30 }
  0x6e   : > { %487 = vrot.lane.b32.xlu0 %v480_v16, %s1766_s7 }
  0x6f   : > { %489 = vrot.lane.b32.xlu1 %v481_v15, %s1766_s7 }
  0x70   : > { %466 = vrot.lane.b32.xlu2 %v457_v17, %s1766_s7 }
  0x76   : > { %491 = vrot.lane.b32.xlu0 %v482_v19, %s1766_s7 }
  0x77   : > { %398 = vrot.lane.b32.xlu1 %v2058_v0, %s1767_s23 }
  0x78   : > { %423 = vrot.lane.b32.xlu2 %v2075_v7, %s1767_s23 }
  0x7e   : > { %400 = vrot.lane.b32.xlu0 %v2061_v1, %s1767_s23 }
  0x7f   : > { %402 = vrot.lane.b32.xlu1 %v2072_v6, %s1767_s23 }
  0x80   : > { %404 = vrot.lane.b32.xlu2 %v2066_v4, %s1767_s23 }
  0x86   : > { %425 = vrot.lane.b32.xlu0 %v2079_v8, %s1767_s23 }
  0x87   : > { %427 = vrot.lane.b32.xlu1 %v2090_v13, %s1767_s23 }
  0x88   : > { %429 = vrot.lane.b32.xlu2 %v2087_v12, %s1767_s23 }
  0x90   : > { %406 = vrot.lane.b32.xlu2 %v2094_v14, %s1767_s23 }
  0x98   : > { %431 = vrot.lane.b32.xlu2 %v2103_v18, %s1767_s23 }
  0xba   : > { %v465_v20 = vpop.permute.xlu2 %464 }
  0xbb   : > { %v476_v45 = vadd.f32 %v465_v20, %v2066_v4 }
  0xc2   : > { %v486_v21 = vpop.permute.xlu2 %485 }
  0xc3   : > { %v499_v25 = vadd.f32 %v486_v21, %v2079_v8  ;;  %v530_v21 = vand.u32 127, %v529_v10 }
  0xc5   : > { %vm531_vm0 = vcmp.ge.s32.totalorder %v530_v21, 8 }
  0xca   : > { %v467_v24 = vpop.permute.xlu2 %466 }
  0xcb   : > { %v477_v41 = vadd.f32 %v467_v24, %v2094_v14 }
  0xd0   : > { %v459_v22 = vpop.permute.xlu0 %458 }
  0xd1   : > { %v461_v23 = vpop.permute.xlu1 %460  ;;  %v473_v29 = vadd.f32 %v459_v22, %v2058_v0 }
  0xd2   : > { %v474_v26 = vadd.f32 %v461_v23, %v2061_v1  ;;  %v424_v33 = vpop.permute.xlu2 %423 }
  0xd3   : > { %v438_v17 = vadd.f32 %v424_v33, %v2075_v7  ;;  %v1768_v33 = vmov 0.0  }
  0xd4   : > { %v504_v30 = vadd.f32 %v499_v25, %v474_v26 }
  0xd6   : > { %v509_v37 = vmul.f32 0.25, %v504_v30 }
  0xd8   : > { %v484_v28 = vpop.permute.xlu0 %483 }
  0xd9   : > { %v463_v27 = vpop.permute.xlu1 %462  ;;  %v498_v32 = vadd.f32 %v484_v28, %v2075_v7 }
  0xda   : > { %v475_v31 = vadd.f32 %v463_v27, %v2072_v6  ;;  %v405_v54 = vpop.permute.xlu2 %404 }
  0xdb   : > { %v503_v35 = vadd.f32 %v498_v32, %v473_v29  ;;  %v521_v36 = vadd.f32 %v498_v32, %v474_v26  ;;  %v416_v22 = vadd.f32 %v405_v54, %v2066_v4  ;;  %v534_v26 = vstv %s533_s11 }
  0xdc   : > { %v522_v34 = vadd.f32 %v499_v25, %v475_v31  ;;  %vm2155_vm1 = vcmp.eq.s32.totalorder %v534_v26, 1 }
  0xdd   : > { %v508_v38 = vmul.f32 0.25, %v503_v35  ;;  %v525_v40 = vmul.f32 0.25, %v521_v36 }
  0xde   : > { %v526_v39 = vmul.f32 0.25, %v522_v34 }
  0xdf   : > { %v1391_v42 = vpack.i.bf16 %v509_v37, %v508_v38  ;;  %v598_v49 = vrot.slane %v525_v40, 7 }
  0xe0   : > { %v488_v44 = vpop.permute.xlu0 %487  ;;  %v599_v48 = vrot.slane %v526_v39, 7 }
  0xe1   : > { %v490_v43 = vpop.permute.xlu1 %489  ;;  %v500_v47 = vadd.f32 %v488_v44, %v2090_v13  ;;  %1392 = vrot.lane.b32.xlu0 %v1391_v42, %s1767_s23 }
  0xe2   : > { %v501_v46 = vadd.f32 %v490_v43, %v2087_v12  ;;  %v1401_v59 = vpack.i.bf16 %v599_v48, %v598_v49  ;;  %v430_v9 = vpop.permute.xlu2 %429 }
  0xe3   : > { %v505_v52 = vadd.f32 %v500_v47, %v475_v31  ;;  %v523_v53 = vadd.f32 %v500_v47, %v476_v45  ;;  %v441_v23 = vadd.f32 %v430_v9, %v2087_v12  ;;  %v2153_v12 = vsel %vm531_vm0, -3.4028235e+38, %v1768_v33 }
  0xe4   : > { %v506_v50 = vadd.f32 %v501_v46, %v476_v45  ;;  %v524_v51 = vadd.f32 %v501_v46, %v477_v41 }
  0xe5   : > { %v510_v56 = vmul.f32 0.25, %v505_v52  ;;  %v527_v58 = vmul.f32 0.25, %v523_v53  ;;  %v446_v27 = vadd.f32 %v441_v23, %v416_v22  ;;  %v537_v53 = vstv %s536_s18  ;;  %s2547_s18 = sld [smem:[#allocation16_spill]] }
  0xe6   : > { %v511_v55 = vmul.f32 0.25, %v506_v50  ;;  %v528_v57 = vmul.f32 0.25, %v524_v51  ;;  %vm2192_vm2 = vcmp.eq.s32.totalorder %v537_v53, 1 }
  0xe7   : > { %v600_v3 = vrot.slane %v527_v58, 7 }
  0xe8   : > { %v1396_v60 = vpack.i.bf16 %v511_v55, %v510_v56  ;;  %v492_v61 = vpop.permute.xlu0 %491  ;;  %v601_v2 = vrot.slane %v528_v57, 7 }
  0xe9   : > { %v399_v62 = vpop.permute.xlu1 %398  ;;  %v502_v63 = vadd.f32 %v492_v61, %v2103_v18  ;;  %1402 = vrot.lane.b32.xlu0 %v1401_v59, %s1767_s23 }
  0xea   : > { %1397 = vrot.lane.b32.xlu1 %v1396_v60, %s1767_s23  ;;  %v1406_v15 = vpack.i.bf16 %v601_v2, %v600_v3  ;;  %v413_v16 = vadd.f32 %v399_v62, %v2058_v0  ;;  %v407_v25 = vpop.permute.xlu2 %406  ;;  %v2207_v62 = vrot.slane %v2153_v12, 1 }
  0xeb   : > { %v507_v5 = vadd.f32 %v502_v63, %v477_v41  ;;  %v417_v31 = vadd.f32 %v407_v25, %v2094_v14 }
  0xec   : > { %v443_v24 = vadd.f32 %v438_v17, %v413_v16 }
  0xed   : > { %v512_v11 = vmul.f32 0.25, %v507_v5 }
  0xee   : > { %v448_v28 = vmul.f32 0.25, %v443_v24 }
  0xf0   : > { %v401_v19 = vpop.permute.xlu0 %400  ;;  %v2164_v14 = vsel %vm2155_vm1, %v2153_v12, %v448_v28 }
  0xf1   : > { %v403_v20 = vpop.permute.xlu1 %402  ;;  %561 = vrot.lane.b32.xlu0 %v512_v11, %s1767_s23  ;;  %v414_v0 = vadd.f32 %v401_v19, %v2061_v1 }
  0xf2   : > { %1407 = vrot.lane.b32.xlu1 %v1406_v15, %s1767_s23  ;;  %v415_v7 = vadd.f32 %v403_v20, %v2072_v6  ;;  %v2159_v6 = vmul.f32 0.25, %v446_v27  ;;  %v432_v49 = vpop.permute.xlu2 %431 }
  0xf3   : > { %v513_v36 = vadd.f32 %v438_v17, %v414_v0  ;;  %v442_v50 = vadd.f32 %v432_v49, %v2103_v18 }
  0xf5   : > { %v2174_v42 = vmul.f32 0.25, %v513_v36  ;;  %v447_v51 = vadd.f32 %v442_v50, %v417_v31 }
  0xf7   : > { %v452_v52 = vmul.f32 0.25, %v447_v51 }
  0xf8   : > { %v426_v29 = vpop.permute.xlu0 %425 }
  0xf9   : > { %v428_v30 = vpop.permute.xlu1 %427  ;;  %v439_v32 = vadd.f32 %v426_v29, %v2079_v8  ;;  %v516_v8 = vadd.f32 %v441_v23, %v417_v31  ;;  %v2199_v55 = vsel %vm2192_vm2, %v2153_v12, %v452_v52 }
  0xfa   : > { %v440_v4 = vadd.f32 %v428_v30, %v2090_v13  ;;  %v1436_v56 = vpack.i.bf16 %v2199_v55, %v2159_v6 }
  0xfb   : > { %v444_v1 = vadd.f32 %v439_v32, %v414_v0  ;;  %v514_v13 = vadd.f32 %v439_v32, %v415_v7  ;;  %v2182_v45 = vmul.f32 0.25, %v516_v8 }
  0xfc   : > { %v445_v35 = vadd.f32 %v440_v4, %v415_v7  ;;  %v515_v39 = vadd.f32 %v440_v4, %v416_v22 }
  0xfd   : > { %v2166_v37 = vmul.f32 0.25, %v444_v1  ;;  %v2176_v43 = vmul.f32 0.25, %v514_v13 }
  0xfe   : > { %v2168_v38 = vmul.f32 0.25, %v445_v35  ;;  %v2178_v44 = vmul.f32 0.25, %v515_v39 }
  0xff   : > { %v1411_v40 = vpack.i.bf16 %v2166_v37, %v2164_v14  ;;  %v1421_v46 = vpack.i.bf16 %v2176_v43, %v2174_v42 }
 0x100   : > { %v1416_v41 = vpack.i.bf16 %v2159_v6, %v2168_v38  ;;  %v1426_v47 = vpack.i.bf16 %v2182_v45, %v2178_v44  ;;  %v1431_v48 = vpack.i.bf16 %v2168_v38, %v2166_v37 }
 0x101   : > { %1412 = vrot.lane.b32.xlu1 %v1411_v40, %s1769_s28 }
 0x102   : > { %1417 = vrot.lane.b32.xlu2 %v1416_v41, %s1769_s28 }
 0x109   : > { %1422 = vrot.lane.b32.xlu1 %v1421_v46, %s1770_s13 }
 0x10a   : > { %1427 = vrot.lane.b32.xlu2 %v1426_v47, %s1770_s13 }
 0x111   : > { %1432 = vrot.lane.b32.xlu1 %v1431_v48, %s1771_s17 }
 0x112   : > { %1437 = vrot.lane.b32.xlu2 %v1436_v56, %s1771_s17  ;;  %s2546_s17 = sld [smem:[#allocation28_spill]] }
 0x153   : > { %v1393_v57 = vpop.permute.xlu0 %1392 }
 0x154   : > { %v1395_v18 = vunpack.i.h.bf16 %v1393_v57  ;;  %v1394_v58 = vunpack.i.l.bf16 %v1393_v57 }
 0x156   : > { %v579_v59 = vrot.slane %v1395_v18, 7  ;;  %v568_v60 = vsel %vm2155_vm1, %v2153_v12, %v1394_v58 }
 0x157   : > { %v578_v61 = vrot.slane %v568_v60, 7 }
 0x158   : > { %v2211_v63 = vsel %vm588_vm3, %v2153_v12, %v579_v59 }
 0x159   : > { %v631_v2 = vrot.slane %v2211_v63, 1  ;;  %v2216_v3 = vsel %vm588_vm3, %v2153_v12, %v578_v61  ;;  %v619_v5 = vmax.f32 %v2211_v63, %v2166_v37 }
 0x15a   : > { %v628_v9 = vrot.slane %v2216_v3, 1  ;;  %v618_v15 = vmax.f32 %v2216_v3, %v2164_v14 }
 0x15b   : > { %v1403_v11 = vpop.permute.xlu0 %1402  ;;  %v2225_v16 = vsel %vm627_vm4, %v631_v2, %v2207_v62 }
 0x15c   : > { %v1398_v10 = vpop.permute.xlu1 %1397  ;;  %v1405_v20 = vunpack.i.h.bf16 %v1403_v11  ;;  %v1404_v21 = vunpack.i.l.bf16 %v1403_v11  ;;  %v2229_v22 = vsel %vm627_vm4, %v628_v9, %v2207_v62  ;;  %v642_v23 = vmax.f32 %v619_v5, %v2225_v16 }
 0x15d   : > { %v1400_v17 = vunpack.i.h.bf16 %v1398_v10  ;;  %v1399_v19 = vunpack.i.l.bf16 %v1398_v10  ;;  %v641_v27 = vmax.f32 %v618_v15, %v2229_v22 }
 0x15e   : > { %v614_v26 = vsel %vm588_vm3, %v2153_v12, %v1404_v21  ;;  %v615_v0 = vsel %vm588_vm3, %v2153_v12, %v1405_v20 }
 0x15f   : > { %v581_v24 = vrot.slane %v1400_v17, 7  ;;  %v580_v25 = vrot.slane %v1399_v19, 7  ;;  %v1441_v7 = vpack.i.bf16 %v615_v0, %v614_v26  ;;  %v646_v30 = vmax.f32 %v642_v23, %v615_v0 }
 0x160   : > { %v657_v31 = vrot.slane %v614_v26, 1  ;;  %v659_v32 = vrot.slane %v615_v0, 1  ;;  %v645_v4 = vmax.f32 %v641_v27, %v614_v26 }
 0x161   : > { %v2239_v28 = vsel %vm588_vm3, %v2153_v12, %v581_v24  ;;  %v2243_v29 = vsel %vm588_vm3, %v2153_v12, %v580_v25  ;;  %1442 = vrot.lane.b32.xlu2 %v1441_v7, %s1772_s8  ;;  %v650_v8 = vmax.f32 %v646_v30, %v2176_v43 }
 0x162   : > { %v633_v33 = vrot.slane %v2243_v29, 1  ;;  %v635_v34 = vrot.slane %v2239_v28, 1  ;;  %v649_v1 = vmax.f32 %v645_v4, %v2174_v42  ;;  %v658_v14 = vsel %vm627_vm4, %v657_v31, %v2207_v62 }
 0x163   : > { %v562_v36 = vpop.permute.xlu0 %561  ;;  %v660_v42 = vsel %vm627_vm4, %v659_v32, %v2207_v62  ;;  %v1451_v53 = vpack.i.bf16 %v2243_v29, %v2211_v63  ;;  %v620_v11 = vmax.f32 %v2243_v29, %v2168_v38  ;;  %v621_v15 = vmax.f32 %v2239_v28, %v2159_v6 }
 0x164   : > { %v1408_v35 = vpop.permute.xlu1 %1407  ;;  %v634_v40 = vsel %vm627_vm4, %v633_v33, %v2207_v62  ;;  %v572_v41 = vsel %vm2192_vm2, %v2153_v12, %v562_v36  ;;  %v636_v46 = vsel %vm627_vm4, %v635_v34, %v2207_v62  ;;  %v669_v47 = vmax.f32 %v649_v1, %v658_v14  ;;  %v1418_v1 = vpop.permute.xlu2 %1417 }
 0x165   : > { %v1410_v13 = vunpack.i.h.bf16 %v1408_v35  ;;  %v1409_v39 = vunpack.i.l.bf16 %v1408_v35  ;;  %v1461_v48 = vpack.i.bf16 %v636_v46, %v634_v40  ;;  %v582_v54 = vrot.slane %v572_v41, 7 }
 0x166   : > { %v670_v56 = vmax.f32 %v650_v8, %v660_v42  ;;  %v673_v57 = vmax.f32 %v669_v47, %v2211_v63  ;;  %v644_v20 = vmax.f32 %v621_v15, %v636_v46  ;;  %v1466_v25 = vpack.i.bf16 %v660_v42, %v658_v14  ;;  %v1236_v14 = vld [vmem:[%s2545_s10 + $0x20] sm:$0xff]  ;;  %v1234_v8 = vld [vmem:[%s2545_s10 + $0x10] sm:$0xff] }
 0x167   : > { %v616_v43 = vsel %vm588_vm3, %v2153_v12, %v1409_v39  ;;  %v617_v49 = vsel %vm588_vm3, %v2153_v12, %v1410_v13  ;;  %1462 = vrot.lane.b32.xlu1 %v1461_v48, %s1766_s7  ;;  %v593_v61 = vsel %vm588_vm3, %v2153_v12, %v582_v54  ;;  %v643_v12 = vmax.f32 %v620_v11, %v634_v40 }
 0x168   : > { %v663_v50 = vrot.slane %v617_v49, 1  ;;  %v1446_v51 = vpack.i.bf16 %v617_v49, %v616_v43  ;;  %v661_v52 = vrot.slane %v616_v43, 1  ;;  %v674_v18 = vmax.f32 %v670_v56, %v2243_v29  ;;  %911 = vmatpush.bf16.msra.mxu0 %v1236_v14  ;;  %1237 = vmatpush.bf16.msra.mxu1 %v1236_v14 }
 0x169   : > { %1452 = vrot.lane.b32.xlu2 %v1451_v53, %s1773_s9  ;;  %v677_v60 = vmax.f32 %v673_v57, %v2166_v37  ;;  %v1456_v17 = vpack.i.bf16 %v593_v61, %v2239_v28  ;;  %v682_v19 = vrot.slane %v593_v61, 1  ;;  %v647_v24 = vmax.f32 %v643_v12, %v616_v43 }
 0x16a   : > { %1447 = vrot.lane.b32.xlu0 %v1446_v51, %s1772_s8  ;;  %v662_v58 = vsel %vm627_vm4, %v661_v52, %v2207_v62  ;;  %v664_v59 = vsel %vm627_vm4, %v663_v50, %v2207_v62  ;;  %v678_v2 = vmax.f32 %v674_v18, %v2168_v38  ;;  %v648_v38 = vmax.f32 %v644_v20, %v617_v49  ;;  %s1193_s8 = sshll.u32 %s2034_s14, 5 }
 0x16b   : > { %v685_v5 = vmax.f32 %v677_v60, %v2225_v16  ;;  %v1471_v9 = vpack.i.bf16 %v664_v59, %v662_v58  ;;  %v683_v21 = vsel %vm627_vm4, %v682_v19, %v2207_v62  ;;  %v651_v26 = vmax.f32 %v647_v24, %v2178_v44 }
 0x16c   : > { %v686_v10 = vmax.f32 %v678_v2, %v634_v40  ;;  %v1486_v23 = vpack.i.bf16 %v683_v21, %v636_v46  ;;  %v652_v0 = vmax.f32 %v648_v38, %v2182_v45  ;;  %v1476_v30 = vpack.i.bf16 %v634_v40, %v2225_v16  ;;  %v2294_v36 = vpop.permute.xlu2 %1427  ;;  %v1233_v40 = vld [vmem:[%s2545_s10 + $0x8] sm:$0xff] }
 0x16d   : > { %v671_v7 = vmax.f32 %v651_v26, %v662_v58  ;;  %v1481_v62 = vpack.i.bf16 %v2225_v16, %v2229_v22  ;;  %v1420_v43 = vunpack.i.h.bf16 %v1418_v1  ;;  %v1419_v49 = vunpack.i.l.bf16 %v1418_v1 }
 0x16e   : > { %v1491_v37 = vpack.i.bf16 %v686_v10, %v685_v5  ;;  %v672_v27 = vmax.f32 %v652_v0, %v664_v59  ;;  %v1430_v54 = vunpack.i.h.bf16 %v2294_v36  ;;  %v1429_v58 = vunpack.i.l.bf16 %v2294_v36 }
 0x16f   : > { %1472 = vrot.lane.b32.xlu1 %v1471_v9, %s1774_s15  ;;  %v675_v31 = vmax.f32 %v671_v7, %v2239_v28  ;;  %v813_v52 = vsel %vm810_vm5, %v2243_v29, %v1419_v49  ;;  %v814_v53 = vsel %vm810_vm5, %v2239_v28, %v1420_v43 }
 0x170   : > { %v676_v32 = vmax.f32 %v672_v27, %v593_v61 }
 0x171   : > { %1492 = vrot.lane.b32.xlu2 %v1491_v37, %s1775_s0  ;;  %v679_v4 = vmax.f32 %v675_v31, %v2159_v6  ;;  %v1235_v6 = vld [vmem:[%s2545_s10 + $0x18] sm:$0xff] }
 0x172   : > { %1457 = vrot.lane.b32.xlu0 %v1456_v17, %s1773_s9  ;;  %v680_v33 = vmax.f32 %v676_v32, %v2199_v55  ;;  %912 = vmatpush.bf16.msra.mxu0 %v1235_v6  ;;  %s1221_s9 = sshll.u32 %s2540_s26, 2  ;;  %s2404_s26 = scalar_lea.vmem [#allocation8], %s1193_s8 }
 0x173   : > { %v687_v44 = vmax.f32 %v679_v4, %v636_v46  ;;  %v1413_v35 = vpop.permute.xlu1 %1412  ;;  %1238 = vmatpush.bf16.msra.mxu1 %v1235_v6  ;;  %v1232_v46 = vld [vmem:[%s2545_s10] sm:$0xff]  ;;  %s1026_s1 = sshll.u32 %s2404_s26, 4  ;;  %s1027_s1 = int_to_ptr.vmem [resolvable:$true] %s1026_s1 }
 0x174   : > { %v688_v34 = vmax.f32 %v680_v33, %v683_v21  ;;  %v2304_v16 = vpop.permute.xlu2 %1437  ;;  %v1415_v50 = vunpack.i.h.bf16 %v1413_v35  ;;  %v1414_v51 = vunpack.i.l.bf16 %v1413_v35 }
 0x175   : > { %v1440_v61 = vunpack.i.h.bf16 %v2304_v16  ;;  %v1439_v29 = vunpack.i.l.bf16 %v2304_v16 }
 0x176   : > { %v1496_v45 = vpack.i.bf16 %v688_v34, %v687_v44  ;;  %913 = vmatpush.bf16.msra.mxu0 %v1234_v8  ;;  %v811_v57 = vsel %vm810_vm5, %v2216_v3, %v1414_v51  ;;  %v812_v18 = vsel %vm810_vm5, %v2211_v63, %v1415_v50 }
 0x177   : > { %1487 = vrot.lane.b32.xlu1 %v1486_v23, %s1775_s0  ;;  %1239 = vmatpush.bf16.msra.mxu1 %v1234_v8 }
 0x17a   : > { %1467 = vrot.lane.b32.xlu0 %v1466_v25, %s1774_s15  ;;  %914 = vmatpush.bf16.msra.mxu0 %v1233_v40  ;;  %s1222_s15 = sshll.u32 %s2547_s18, 3  ;;  %s1628_s18 = scalar_lea.hbm %s2549_s12, 128 }
 0x17b   : > { %v2302_v55 = vpop.permute.xlu1 %1422  ;;  %1240 = vmatpush.bf16.msra.mxu1 %v1233_v40 }
 0x17c   : > { %v1425_v28 = vunpack.i.h.bf16 %v2302_v55  ;;  %v1424_v3 = vunpack.i.l.bf16 %v2302_v55 }
 0x17e   : > { %915 = vmatpush.bf16.msra.mxu0 %v1232_v46 }
 0x17f   : > { %1241 = vmatpush.bf16.msra.mxu1 %v1232_v46 }
 0x182   : > { %1477 = vrot.lane.b32.xlu0 %v1476_v30, %s1775_s0 }
 0x183   : > { %v2309_v13 = vpop.permute.xlu1 %1432 }
 0x184   : > { %v1435_v63 = vunpack.i.h.bf16 %v2309_v13  ;;  %v1434_v11 = vunpack.i.l.bf16 %v2309_v13 }
 0x18a   : > { %1482 = vrot.lane.b32.xlu0 %v1481_v62, %s1766_s7  ;;  %s1012_s7 = scalar_lea.sflag [#allocation4], %s2034_s14 }
 0x192   : > { %1497 = vrot.lane.b32.xlu0 %v1496_v45, %s1775_s0  ;;  %s1023_s0 = sadd.s32 %s1222_s15, %s1221_s9 }
 0x193   : > { %s1223_s4 = sshll.u32 %s1023_s0, 3 }
 0x194   : > { %s1025_s21 = scalar_lea.hbm %s2548_s30, %s1223_s4 }
 0x195   : > { %s1028_s5 = sshll.u32 %s1025_s21, 4  ;;  %s1029_s5 = int_to_ptr.hbm [resolvable:$true] %s1028_s5 }
 0x196   : > { %s1622_s23 = sshra.s32 %s1029_s5, 4  ;;  %s1623_s23 = int_to_ptr.hbm [resolvable:$true] %s1622_s23 }
 0x197   : > { %s1624_s11 = scalar_lea.hbm %s1623_s23, 32  ;;  %p1629_p8 = scmp.lt.s32.totalorder %s1623_s23, %s2549_s12 }
 0x198   : > { %p1625_p5 = scmp.ne.s32.totalorder %s1623_s23, %s1624_s11  ;;  %p1630_p9 = scmp.lt.s32.totalorder %s1628_s18, %s1624_s11 }
 0x19a   : > { %p1626_p0 = pnand %p1625_p5, %p1977_p3  ;;  %p1631_p10 = por %p1630_p9, %p1629_p8 }
 0x19c   : > { %p1627_p7 = pneg %p1626_p0 }
 0x19e   : > { %p1632_p12 = pnand %p1631_p10, %p1627_p7 }
 0x1bb   : > { %v2316_v41 = vpop.permute.xlu2 %1442 }
 0x1bc   : > { %v1445_v10 = vunpack.i.h.bf16 %v2316_v41  ;;  %v1444_v15 = vunpack.i.l.bf16 %v2316_v41 }
 0x1c3   : > { %v2323_v48 = vpop.permute.xlu2 %1452 }
 0x1c4   : > { %v1455_v37 = vunpack.i.h.bf16 %v2323_v48  ;;  %v1454_v23 = vunpack.i.l.bf16 %v2323_v48 }
 0x1cb   : > { %v1493_v17 = vpop.permute.xlu2 %1492 }
 0x1cc   : > { %v1495_v26 = vunpack.i.h.bf16 %v1493_v17  ;;  %v1494_v32 = vunpack.i.l.bf16 %v1493_v17 }
 0x1d9   : > { %v1463_v42 = vpop.permute.xlu1 %1462 }
 0x1da   : > { %v1464_v59 = vunpack.i.l.bf16 %v1463_v42  ;;  %v1465_v2 = vunpack.i.h.bf16 %v1463_v42 }
 0x1dc   : > { %v1448_v22 = vpop.permute.xlu0 %1447  ;;  %v818_v19 = vsel %vm815_vm6, %v813_v52, %v1464_v59  ;;  %v819_v12 = vsel %vm815_vm6, %v814_v53, %v1465_v2 }
 0x1dd   : > { %v1449_v5 = vunpack.i.l.bf16 %v1448_v22  ;;  %v1450_v9 = vunpack.i.h.bf16 %v1448_v22 }
 0x1df   : > { %v823_v20 = vsel %vm820_vm7, %v818_v19, %v1449_v5  ;;  %v824_v24 = vsel %vm820_vm7, %v819_v12, %v1450_v9 }
 0x1e0   : > { %v828_v7 = vsel %vm825_vm8, %v823_v20, %v1429_v58  ;;  %v829_v62 = vsel %vm825_vm8, %v824_v24, %v1430_v54 }
 0x1e1   : > { %v1473_v60 = vpop.permute.xlu1 %1472 }
 0x1e2   : > { %v1474_v21 = vunpack.i.l.bf16 %v1473_v60  ;;  %v1475_v38 = vunpack.i.h.bf16 %v1473_v60 }
 0x1e4   : > { %v2311_v39 = vpop.permute.xlu0 %1457  ;;  %v833_v4 = vsel %vm830_vm9, %v828_v7, %v1474_v21  ;;  %v834_v33 = vsel %vm830_vm9, %v829_v62, %v1475_v38 }
 0x1e5   : > { %v1459_v25 = vunpack.i.l.bf16 %v2311_v39  ;;  %v1460_v27 = vunpack.i.h.bf16 %v2311_v39 }
 0x1e7   : > { %v838_v44 = vsel %vm835_vm10, %v833_v4, %v1459_v25  ;;  %v839_v55 = vsel %vm835_vm10, %v834_v33, %v1460_v27 }
 0x1e8   : > { %v843_v48 = vsel %vm840_vm11, %v838_v44, %v1439_v29  ;;  %v844_v43 = vsel %vm840_vm11, %v839_v55, %v1440_v61  ;;  %v1501_v29 = vld [vmem:[%s2546_s17] ss:$0 sm:$0xff] }
 0x1e9   : > { %v1488_v34 = vpop.permute.xlu1 %1487 }
 0x1ea   : > { %v1490_v8 = vunpack.i.h.bf16 %v1488_v34  ;;  %v1489_v13 = vunpack.i.l.bf16 %v1488_v34 }
 0x1ec   : > { %v2321_v47 = vpop.permute.xlu0 %1467 }
 0x1ed   : > { %v1470_v35 = vunpack.i.h.bf16 %v2321_v47  ;;  %v1469_v36 = vunpack.i.l.bf16 %v2321_v47 }
 0x1f4   : > { %v2328_v56 = vpop.permute.xlu0 %1477 }
 0x1f5   : > { %v1480_v41 = vunpack.i.h.bf16 %v2328_v56  ;;  %v1479_v46 = vunpack.i.l.bf16 %v2328_v56  ;;  %v848_v56 = vsel %vm845_vm12, %v843_v48, %v1489_v13 }
 0x1fc   : > { %v1483_v0 = vpop.permute.xlu0 %1482 }
 0x1fd   : > { %v1485_v30 = vunpack.i.h.bf16 %v1483_v0  ;;  %v1484_v31 = vunpack.i.l.bf16 %v1483_v0 }
 0x1ff   : > { %v817_v45 = vsel %vm815_vm6, %v812_v18, %v1485_v30  ;;  %v816_v1 = vsel %vm815_vm6, %v811_v57, %v1484_v31  ;;  %v849_v18 = vsel %vm845_vm12, %v844_v43, %v1490_v8 }
 0x200   : > { %v822_v14 = vsel %vm820_vm7, %v817_v45, %v1445_v10  ;;  %v821_v6 = vsel %vm820_vm7, %v816_v1, %v1444_v15 }
 0x201   : > { %v827_v16 = vsel %vm825_vm8, %v822_v14, %v1425_v28  ;;  %v826_v22 = vsel %vm825_vm8, %v821_v6, %v1424_v3 }
 0x202   : > { %v832_v39 = vsel %vm830_vm9, %v827_v16, %v1470_v35  ;;  %v831_v40 = vsel %vm830_vm9, %v826_v22, %v1469_v36 }
 0x203   : > { %v836_v42 = vsel %vm835_vm10, %v831_v40, %v1454_v23  ;;  %v837_v47 = vsel %vm835_vm10, %v832_v39, %v1455_v37 }
 0x204   : > { %v1498_v49 = vpop.permute.xlu0 %1497  ;;  %v841_v50 = vsel %vm840_vm11, %v836_v42, %v1434_v11  ;;  %v842_v51 = vsel %vm840_vm11, %v837_v47, %v1435_v63 }
 0x205   : > { %v1500_v52 = vunpack.i.h.bf16 %v1498_v49  ;;  %v1499_v53 = vunpack.i.l.bf16 %v1498_v49  ;;  %v846_v54 = vsel %vm845_vm12, %v841_v50, %v1479_v46  ;;  %v847_v57 = vsel %vm845_vm12, %v842_v51, %v1480_v41 }
 0x206   : > { %v851_v58 = vsel %vm850_vm13, %v846_v54, %v1494_v32  ;;  %v852_v59 = vsel %vm850_vm13, %v847_v57, %v1495_v26 }
 0x207   : > { %v855_v60 = vpack.c.bf16 %v852_v59, %v851_v58  ;;  %v853_v61 = vsel %vm850_vm13, %v848_v56, %v1499_v53  ;;  %v854_v2 = vsel %vm850_vm13, %v849_v18, %v1500_v52 }
 0x208   : > { %v856_v5 = vpack.c.bf16 %v854_v2, %v853_v61 }
 0x209   : > { %1214 = vmatmul.msk.bf16.vlgmr.msra.gmra.mxu0 %vm901_vm14, %v855_v60 }
 0x20a   : > { %1215 = vmatmul.msk.bf16.vlgmr.msra.gmra.mxu1 %vm901_vm14, %v856_v5 }
 0x286   : > { %v917_v28 = vpop.f32.mrf.mxu0 }
 0x287   : > { %v918_v9 = vadd.f32 %v1501_v29, %v917_v28  ;;  %v922_v10 = vpop.f32.mrf.mxu1 }
 0x288   : > { %v923_v3 = vadd.f32 %v1501_v29, %v922_v10 }
 0x289   : > { %v1216_v63 = vmul.f32 -1.442695, %v918_v9 }
 0x28a   : > { %v1218_v11 = vmul.f32 -1.442695, %v923_v3 }
 0x28b   : > { %1502 = vpow2.f32 %v1216_v63 }
 0x28c   : > { %1504 = vpow2.f32 %v1218_v11 }
 0x28e   : > { %v919_v15 = vpop.f32.mrf.mxu0 }
 0x28f   : > { %v2386_v17 = vadd.f32 %v1501_v29, %v919_v15  ;;  %v924_v19 = vpop.f32.mrf.mxu1 }
 0x290   : > { %v2388_v37 = vadd.f32 %v1501_v29, %v924_v19 }
 0x291   : > { %v1503_v12 = vpop.eup %1502  ;;  %v1217_v20 = vmul.f32 -1.442695, %v2386_v17 }
 0x292   : > { %v1505_v21 = vpop.eup %1504  ;;  %v939_v23 = vadd.f32 1.0, %v1503_v12  ;;  %v1219_v24 = vmul.f32 -1.442695, %v2388_v37 }
 0x293   : > { %v941_v38 = vadd.f32 1.0, %v1505_v21  ;;  %1506 = vpow2.f32 %v1217_v20 }
 0x294   : > { %1508 = vrcp.f32 %v939_v23  ;;  %v952_v4 = vand.u32 2147483647, %v939_v23  ;;  %v954_v33 = vand.u32 2147483648, %v939_v23  ;;  %vm948_vm1 = vweird.f32 %v939_v23 }
 0x295   : > { %1510 = vrcp.f32 %v941_v38  ;;  %v984_v45 = vand.u32 2147483648, %v941_v38  ;;  %v982_v35 = vand.u32 2147483647, %v941_v38  ;;  %vm978_vm3 = vweird.f32 %v941_v38 }
 0x296   : > { %1512 = vpow2.f32 %v1219_v24  ;;  %v955_v6 = vor.u32 1.1754944e-38, %v954_v33  ;;  %vm953_vm4 = vcmp.eq.f32.partialorder %v952_v4, 8.507059e+37 }
 0x297   : > { %v985_v22 = vor.u32 1.1754944e-38, %v984_v45  ;;  %vm983_vm7 = vcmp.eq.f32.partialorder %v982_v35, 8.507059e+37 }
 0x299   : > { %v1507_v25 = vpop.eup %1506 }
 0x29a   : > { %v1509_v26 = vpop.eup %1508  ;;  %v2392_v0 = vadd.f32 1.0, %v1507_v25 }
 0x29b   : > { %v1511_v7 = vpop.eup %1510  ;;  %v944_v27 = vmul.f32 %v1509_v26, %v939_v23  ;;  %vm949_vm15 = vweird.f32 %v1509_v26 }
 0x29c   : > { %v1513_v30 = vpop.eup %1512  ;;  %v974_v31 = vmul.f32 %v1511_v7, %v941_v38  ;;  %1514 = vrcp.f32 %v2392_v0  ;;  %vm979_vm0 = vweird.f32 %v1511_v7  ;;  %vm950_vm2 = vmor %vm948_vm1, %vm949_vm15  ;;  %v969_v48 = vand.u32 2147483648, %v2392_v0 }
 0x29d   : > { %v945_v32 = vsub.f32 1.0, %v944_v27  ;;  %v2395_v62 = vadd.f32 1.0, %v1513_v30  ;;  %vm980_vm5 = vmor %vm978_vm3, %vm979_vm0  ;;  %v967_v50 = vand.u32 2147483647, %v2392_v0  ;;  %vm963_vm9 = vweird.f32 %v2392_v0 }
 0x29e   : > { %v975_v44 = vsub.f32 1.0, %v974_v31  ;;  %v970_v54 = vor.u32 1.1754944e-38, %v969_v48 }
 0x29f   : > { %v946_v34 = vmul.f32 %v1509_v26, %v945_v32  ;;  %1516 = vrcp.f32 %v2395_v62  ;;  %v999_v53 = vand.u32 2147483648, %v2395_v62  ;;  %v997_v56 = vand.u32 2147483647, %v2395_v62 }
 0x2a0   : > { %v976_v1 = vmul.f32 %v1511_v7, %v975_v44  ;;  %vm968_vm12 = vcmp.eq.f32.partialorder %v967_v50, 8.507059e+37  ;;  %vm993_vm13 = vweird.f32 %v2395_v62 }
 0x2a1   : > { %v947_v36 = vadd.f32 %v1509_v26, %v946_v34  ;;  %v1000_v61 = vor.u32 1.1754944e-38, %v999_v53  ;;  %vm998_vm15 = vcmp.eq.f32.partialorder %v997_v56, 8.507059e+37 }
 0x2a2   : > { %v1515_v14 = vpop.eup %1514  ;;  %v977_v55 = vadd.f32 %v1511_v7, %v976_v1 }
 0x2a3   : > { %v951_v16 = vsel %vm950_vm2, %v1509_v26, %v947_v36  ;;  %v959_v8 = vmul.f32 %v1515_v14, %v2392_v0  ;;  %vm964_vm8 = vweird.f32 %v1515_v14 }
 0x2a4   : > { %v956_v13 = vsel %vm953_vm4, %v955_v6, %v951_v16  ;;  %v981_v39 = vsel %vm980_vm5, %v1511_v7, %v977_v55  ;;  %vm965_vm10 = vmor %vm963_vm9, %vm964_vm8 }
 0x2a5   : > { %v1517_v40 = vpop.eup %1516  ;;  %v1003_v41 = vmul.f32 %v956_v13, %v918_v9  ;;  %v986_v46 = vsel %vm983_vm7, %v985_v22, %v981_v39  ;;  %v960_v42 = vsub.f32 1.0, %v959_v8 }
 0x2a6   : > { %v1005_v47 = vmul.f32 %v986_v46, %v923_v3  ;;  %v989_v43 = vmul.f32 %v1517_v40, %v2395_v62  ;;  %vm994_vm11 = vweird.f32 %v1517_v40 }
 0x2a7   : > { %1007 = vst.msk [vmem:[%s2404_s26] sm:$0xff] %vm815_vm6, %v1003_v41  ;;  %v961_v49 = vmul.f32 %v1515_v14, %v960_v42  ;;  %vm995_vm14 = vmor %vm993_vm13, %vm994_vm11 }
 0x2a8   : > { %1009 = vst.msk [vmem:[%s2404_s26 + $0x10] sm:$0xff] %vm815_vm6, %v1005_v47  ;;  %v990_v51 = vsub.f32 1.0, %v989_v43 }
 0x2a9   : > { %v962_v52 = vadd.f32 %v1515_v14, %v961_v49 }
 0x2aa   : > { %v991_v57 = vmul.f32 %v1517_v40, %v990_v51 }
 0x2ab   : > { %v966_v18 = vsel %vm965_vm10, %v1515_v14, %v962_v52 }
 0x2ac   : > { %v971_v58 = vsel %vm968_vm12, %v970_v54, %v966_v18  ;;  %v992_v59 = vadd.f32 %v1517_v40, %v991_v57 }
 0x2ad   : > { %v1004_v60 = vmul.f32 %v971_v58, %v2386_v17 }
 0x2ae   : > { %v996_v2 = vsel %vm995_vm14, %v1517_v40, %v992_v59 }
 0x2af   : > { %1008 = vst.msk [vmem:[%s2404_s26 + $0x8] sm:$0xff] %vm815_vm6, %v1004_v60  ;;  %v1001_v5 = vsel %vm998_vm15, %v1000_v61, %v996_v2 }
 0x2b0   : > { %v1006_v29 = vmul.f32 %v1001_v5, %v2388_v37 }
 0x2b2   : > { %1010 = vst.msk [vmem:[%s2404_s26 + $0x18] sm:$0xff] %vm815_vm6, %v1006_v29 }
 0x2b3   : > { %1635 = shalt.err (!%p1632_p12)
}
 0x2b4   : > { %s1776_s14 = smov 128  }
 0x2b5   : > { %1248 = dma.vmem_to_hbm [thread:$0]  (%p1977_p3), %s1027_s1, 512, %s1029_s5, %s1012_s7, %s1776_s14, %s1776_s14, %s1769_s28  }
 0x2b6 PF: > { %p1265_p4 = scmp.ge.s32.totalorder %s1762_s6, 2  ;;  %s1043_s0 = sand.u32 1, %s1734_s24  }
 0x2b7   : > { %s1044_s26 = scalar_lea.sflag [#allocation4], %s1043_s0 }
 0x2b8   : > { %p1261_p1 = pnand %p1265_p4, %p1981_p6 }
 0x2ba   : > { %p1262_p2 = pneg %p1261_p1 }
 0x2bc   : > { %1705 = dma.done.wait (%p1262_p2), %s1044_s26, 512  }
 0x2bd   : > { %1707 = vsyncadd (%p1262_p2), %s1044_s26, 4294966784  ;;  %s24_s6 = sadd.s32 1, %s1762_s6   ;;  %s2552_s16 = sld [smem:[#allocation13_spill]] }
 0x2be   : > { %p2442_p11 = scmp.ge.s32.totalorder %s24_s6, 6   ;;  %s2553_s23 = sld [smem:[#allocation22_spill]] }
 0x2bf   : > { %s2554_s28 = sld [smem:[#allocation14_spill]]  ;;  %s2560_s18 = smov %s1714_s19 }
 0x2c0   : > { %s2555_s26 = sld [smem:[#allocation23_spill]]  ;;  %s2561_s19 = smov %s1718_s20 }
 0x2c1   : > { %s2556_s27 = sld [smem:[#allocation17_spill]]  ;;  %s2562_s20 = smov %s2021_s29 }
 0x2c2   : > { %s2557_s3 = sld [smem:[#allocation18_spill]]  ;;  %s2563_s21 = smov %s1726_s22 }
 0x2c3   : > { %s2558_s30 = sld [smem:[#allocation19_spill]]  ;;  %s2564_s22 = smov %s2552_s16 }
 0x2c4   : > { %s2559_s1 = sld [smem:[#allocation20_spill]]  ;;  %s2565_s24 = smov %s1738_s25 }
 0x2c5   : > { %s2566_s25 = smov %s2554_s28 }
 0x2c6   :  { %23 = sbr.rel (!%p2442_p11) target bundleno = 18 (0x12), region = 109 }
 0x2c8   : > { %s2567_s28 = smov %s2557_s3 }
 0x2c9   : > { %s2568_s29 = smov %s2558_s30 }
 0x2ca   : > { %s2569_s30 = smov %s2559_s1 }
 0x2cb   :  { %1050 = vsyncpa [#allocation3], 1 }
 0x2cc   :  { %1052 = vsyncpa [#allocation3 + $0x1], 1 }
 0x2cd   :  { %1053 = vsyncpa [#allocation6], 1 }
 0x2ce   :  { %1055 = vsyncpa [#allocation6 + $0x1], 1 }
 0x2cf   :  { %1056 = vsyncpa [#allocation4], 1 }
 0x2d0   :  { %1058 = vsyncpa [#allocation4 + $0x1], 1 }

</bundles_post_ra>
